<compile_context>
chip_gen: v7x
topology: tpu7x:2x2x1
jax: 0.10.0
libtpu: 0.0.40
codegen_flags: <defaults>
</compile_context>

<pallas_src>
import jax
import jax.numpy as jnp
import numpy as np
from jax import lax
from jax.experimental import pallas as pl
from jax.experimental.pallas import tpu as pltpu


# Number of lane-blocks the im2col columns (B*Ho*Wo) are split into per conv
# layer.  Keep 1 on v5e/v6e (single TensorCore: extra grid steps are pure
# serial overhead).  Set to 2 on v7x so the "parallel" grid axis shards the
# work across both TensorCores.
M_BLOCKS = 1


def _round_up(x, m):
    return (x + m - 1) // m * m


# ----------------------------- Pallas kernels ------------------------------

def fc_kernel(x_ref, w_ref, b_ref, o_ref):
    # x: (B, In), w: (In, Out), b: (1, Out) -> o: (B, Out).  Out=512 lanes.
    acc = jnp.dot(x_ref[...], w_ref[...], preferred_element_type=jnp.float32)
    o_ref[...] = (acc + b_ref[...]).astype(o_ref.dtype)


def make_convT_kernel(activation):
    """One transposed-conv layer as a single transposed im2col matmul.

    p_ref: (K, Mblk)   im2col patches, K = k*k*Cin rows, output pixels on lanes
    w_ref: (Cout, K)   flipped/flattened ConvTranspose2d weight
    b_ref: (Cout, 1)
    o_ref: (Cout, Mblk)  lane-dense output block
    """
    def kernel(p_ref, w_ref, b_ref, o_ref):
        acc = jnp.dot(w_ref[...], p_ref[...], preferred_element_type=jnp.float32)
        acc = acc + b_ref[...]
        if activation == "relu":
            acc = jnp.maximum(acc, 0.0)
        else:  # sigmoid
            acc = jax.nn.sigmoid(acc)
        o_ref[...] = acc.astype(o_ref.dtype)
    return kernel


# ------------------------------ JAX wrappers --------------------------------

def linear_pallas(x, w_t, b2d):
    """x: (B, In), w_t: (In, Out), b2d: (1, Out) -> (B, Out)."""
    B, In = x.shape
    Out = w_t.shape[1]
    return pl.pallas_call(
        fc_kernel,
        out_shape=jax.ShapeDtypeStruct((B, Out), jnp.float32),
        grid=(1,),
        in_specs=[
            pl.BlockSpec((B, In), lambda i: (0, 0)),
            pl.BlockSpec((In, Out), lambda i: (0, 0)),
            pl.BlockSpec((1, Out), lambda i: (0, 0)),
        ],
        out_specs=pl.BlockSpec((B, Out), lambda i: (0, 0)),
    )(x, w_t, b2d)


def conv_transpose2d_pallas(x_cbhw, w_t, b_col, stride, out_pad, activation):
    """ConvTranspose2d (padding=0) + activation, CBHW in / CBHW out.

    x_cbhw: (Cin, B, H, W); w_t: (Cout, k*k*Cin) prepared weight; b_col: (Cout,1)
    Returns (Cout, B, Ho, Wo) with Ho = (H-1)*stride + k + out_pad.
    """
    Cin, B, H, W = x_cbhw.shape
    Cout, K = w_t.shape
    k = int(round((K // Cin) ** 0.5))

    # --- glue: zero-dilation + edge padding in ONE lax.pad (interior padding)
    plo, phi = k - 1, k - 1 + out_pad
    zero = jnp.array(0.0, dtype=x_cbhw.dtype)
    xp = lax.pad(x_cbhw, zero,
                 ((0, 0, 0), (0, 0, 0),
                  (plo, phi, stride - 1), (plo, phi, stride - 1)))
    Hp, Wp = xp.shape[2], xp.shape[3]
    Ho, Wo = Hp - k + 1, Wp - k + 1
    M = B * Ho * Wo

    # --- glue: transposed im2col slab (k*k*Cin, M); row index = tap*Cin + c
    slabs = [xp[:, :, kh:kh + Ho, kw:kw + Wo].reshape(Cin, M)
             for kh in range(k) for kw in range(k)]
    p_t = jnp.concatenate(slabs, axis=0)                       # (K, M)

    # pad M to a multiple of 128*M_BLOCKS -> unmasked, lane-dense stores
    M_pad = _round_up(M, 128 * M_BLOCKS)
    if M_pad != M:
        p_t = jnp.pad(p_t, ((0, 0), (0, M_pad - M)))
    Mblk = M_pad // M_BLOCKS

    out = pl.pallas_call(
        make_convT_kernel(activation),
        out_shape=jax.ShapeDtypeStruct((Cout, M_pad), jnp.float32),
        grid=(M_BLOCKS,),
        in_specs=[
            pl.BlockSpec((K, Mblk), lambda g: (0, g)),
            pl.BlockSpec((Cout, K), lambda g: (0, 0)),
            pl.BlockSpec((Cout, 1), lambda g: (0, 0)),
        ],
        out_specs=pl.BlockSpec((Cout, Mblk), lambda g: (0, g)),
        compiler_params=pltpu.CompilerParams(
            dimension_semantics=("parallel",)),
    )(p_t, w_t, b_col)

    return out[:, :M].reshape(Cout, B, Ho, Wo)


def prepare_params(params):
    """One-time reshaping of PyTorch-layout params into kernel-ready form."""
    prep = {
        "fc_wT": jnp.transpose(params["fc_w"]),                 # (In, Out)
        "fc_b": params["fc_b"].reshape(1, -1),                  # (1, Out)
    }
    for i in (1, 2, 3, 4):
        wt = params[f"conv{i}_w"]                               # (Cin, Cout, k, k)
        Cin, Cout, k, _ = wt.shape
        wflip = wt[:, :, ::-1, ::-1]                            # spatial flip
        # (Cout, kh, kw, Cin) flattened -> row index = (kh*k+kw)*Cin + c
        prep[f"conv{i}_wT"] = jnp.transpose(
            wflip, (1, 2, 3, 0)).reshape(Cout, k * k * Cin)
        prep[f"conv{i}_b"] = params[f"conv{i}_b"].reshape(Cout, 1)
    return prep


def generator_forward(prep, z):
    """Mirrors Generator.forward.  z: (B, input_size) -> (B, 1, 28, 28) NCHW."""
    B = z.shape[0]
    nc = prep["fc_wT"].shape[1] // 16
    h = linear_pallas(z, prep["fc_wT"], prep["fc_b"])           # (B, nc*16)
    x = h.reshape(B, nc, 4, 4)                                  # NCHW .view
    x = jnp.transpose(x, (1, 0, 2, 3))                          # -> CBHW glue layout
    x = conv_transpose2d_pallas(x, prep["conv1_wT"], prep["conv1_b"], 2, 1, "relu")
    x = conv_transpose2d_pallas(x, prep["conv2_wT"], prep["conv2_b"], 1, 0, "relu")
    x = conv_transpose2d_pallas(x, prep["conv3_wT"], prep["conv3_b"], 2, 1, "relu")
    x = conv_transpose2d_pallas(x, prep["conv4_wT"], prep["conv4_b"], 1, 0, "sigmoid")
    return jnp.transpose(x, (1, 0, 2, 3))                       # CBHW -> NCHW


# ----------------------- deterministic parameter init -----------------------

def init_params(key, input_size, nc):
    def u(k, shape, fan_in):
        bound = 1.0 / np.sqrt(fan_in)
        return jax.random.uniform(k, shape, jnp.float32, -bound, bound)

    ks = jax.random.split(key, 10)
    p = {}
    p["fc_w"] = u(ks[0], (nc * 16, input_size), input_size)
    p["fc_b"] = u(ks[1], (nc * 16,), input_size)
    # PyTorch ConvTranspose2d weight layout: (Cin, Cout, k, k)
    p["conv1_w"] = u(ks[2], (nc, nc // 2, 3, 3), nc * 9)
    p["conv1_b"] = u(ks[3], (nc // 2,), nc * 9)
    p["conv2_w"] = u(ks[4], (nc // 2, nc // 4, 3, 3), (nc // 2) * 9)
    p["conv2_b"] = u(ks[5], (nc // 4,), (nc // 2) * 9)
    p["conv3_w"] = u(ks[6], (nc // 4, nc // 8, 3, 3), (nc // 4) * 9)
    p["conv3_b"] = u(ks[7], (nc // 8,), (nc // 4) * 9)
    p["conv4_w"] = u(ks[8], (nc // 8, 1, 3, 3), (nc // 8) * 9)
    p["conv4_b"] = u(ks[9], (1,), (nc // 8) * 9)
    return p


# ------------------------------ pure-JAX reference ---------------------------

def ref_conv_transpose(x_nchw, wt, b, stride, out_pad):
    k = wt.shape[2]
    w = jnp.transpose(wt[:, :, ::-1, ::-1], (1, 0, 2, 3))  # OIHW
    y = lax.conv_general_dilated(
        x_nchw, w, window_strides=(1, 1),
        padding=((k - 1, k - 1 + out_pad), (k - 1, k - 1 + out_pad)),
        lhs_dilation=(stride, stride),
        dimension_numbers=("NCHW", "OIHW", "NCHW"))
    return y + b[None, :, None, None]


def ref_forward(params, z):
    B = z.shape[0]
    nc = params["conv1_w"].shape[0]
    h = z @ params["fc_w"].T + params["fc_b"]
    h = h.reshape(B, nc, 4, 4)
    h = jax.nn.relu(ref_conv_transpose(h, params["conv1_w"], params["conv1_b"], 2, 1))
    h = jax.nn.relu(ref_conv_transpose(h, params["conv2_w"], params["conv2_b"], 1, 0))
    h = jax.nn.relu(ref_conv_transpose(h, params["conv3_w"], params["conv3_b"], 2, 1))
    h = jax.nn.sigmoid(ref_conv_transpose(h, params["conv4_w"], params["conv4_b"], 1, 0))
    return h


# ----------------------------------- main ------------------------------------

if __name__ == "__main__":
    B, input_size, num_channels = 2, 16, 32   # small config: 16->512 fc, 32->1 channels
    key = jax.random.PRNGKey(0)
    kz, kp = jax.random.split(key)
    params = init_params(kp, input_size, num_channels)
    z = jax.random.normal(kz, (B, input_size), jnp.float32)

    prep = prepare_params(params)             # one-time weight restructuring
    out = jax.jit(generator_forward)(prep, z)
    out = jax.block_until_ready(out)
    assert out.shape == (B, 1, 28, 28), out.shape

    ref = jax.block_until_ready(ref_forward(params, z))
    np.testing.assert_allclose(np.asarray(out), np.asarray(ref),
                               atol=2e-4, rtol=2e-4)
    print("KERNEL_OK")
</pallas_src>

<mosaic_0001>
module attributes {stable_mosaic.version = 11 : i64} {
  func.func @fc_kernel(%arg0: i32, %arg1: memref<2x16xf32, #tpu.memory_space<vmem>>, %arg2: memref<16x512xf32, #tpu.memory_space<vmem>>, %arg3: memref<1x512xf32, #tpu.memory_space<vmem>>, %arg4: memref<2x512xf32, #tpu.memory_space<vmem>>) attributes {dimension_semantics = [#tpu.dimension_semantics<arbitrary>], iteration_bounds = array<i64: 1>, scalar_prefetch = 0 : i64, scratch_operands = 0 : i64, tpu.core_type = #tpu.core_type<tc>, window_params = [{pipeline_mode = #tpu.pipeline_mode<synchronous>, transform_indices = @transform_0, window_bounds = array<i64: 2, 16>}, {pipeline_mode = #tpu.pipeline_mode<synchronous>, transform_indices = @transform_1, window_bounds = array<i64: 16, 512>}, {pipeline_mode = #tpu.pipeline_mode<synchronous>, transform_indices = @transform_2, window_bounds = array<i64: 1, 512>}, {pipeline_mode = #tpu.pipeline_mode<synchronous>, transform_indices = @transform_3, window_bounds = array<i64: 2, 512>}]} {
    %c0 = arith.constant 0 : index
    %c0_0 = arith.constant 0 : index
    %0 = vector.load %arg1[%c0, %c0_0] : memref<2x16xf32, #tpu.memory_space<vmem>>, vector<2x16xf32>
    %c0_1 = arith.constant 0 : index
    %c0_2 = arith.constant 0 : index
    %1 = vector.load %arg2[%c0_1, %c0_2] : memref<16x512xf32, #tpu.memory_space<vmem>>, vector<16x512xf32>
    %cst = arith.constant dense<0.000000e+00> : vector<2x512xf32>
    %2 = tpu.matmul %0, %1, %cst {dimension_numbers = #tpu.dot_dimension_numbers<[1], [0], [0], [1], [0, 0, 1, 1], [], []>} : vector<2x16xf32>, vector<16x512xf32>, vector<2x512xf32> -> vector<2x512xf32>
    %c0_3 = arith.constant 0 : index
    %c0_4 = arith.constant 0 : index
    %3 = vector.load %arg3[%c0_3, %c0_4] : memref<1x512xf32, #tpu.memory_space<vmem>>, vector<1x512xf32>
    %4 = vector.broadcast %3 : vector<1x512xf32> to vector<2x512xf32>
    %5 = arith.addf %2, %4 : vector<2x512xf32>
    %c0_5 = arith.constant 0 : index
    %c0_6 = arith.constant 0 : index
    %6 = vector.load %arg4[%c0_5, %c0_6] : memref<2x512xf32, #tpu.memory_space<vmem>>, vector<2x512xf32>
    tpu.vector_store %arg4[%c0_5, %c0_6], %5 {strides = array<i32>} : memref<2x512xf32, #tpu.memory_space<vmem>>, vector<2x512xf32>,
    return
  }
  func.func @transform_0(%arg0: i32) -> (i32, i32) {
    %c0_i32 = arith.constant 0 : i32
    %c0_i32_0 = arith.constant 0 : i32
    %c0_i32_1 = arith.constant 0 : i32
    return %c0_i32, %c0_i32_0 : i32, i32
  }
  func.func @transform_1(%arg0: i32) -> (i32, i32) {
    %c0_i32 = arith.constant 0 : i32
    %c0_i32_0 = arith.constant 0 : i32
    %c0_i32_1 = arith.constant 0 : i32
    return %c0_i32, %c0_i32_0 : i32, i32
  }
  func.func @transform_2(%arg0: i32) -> (i32, i32) {
    %c0_i32 = arith.constant 0 : i32
    %c0_i32_0 = arith.constant 0 : i32
    %c0_i32_1 = arith.constant 0 : i32
    return %c0_i32, %c0_i32_0 : i32, i32
  }
  func.func @transform_3(%arg0: i32) -> (i32, i32) {
    %c0_i32 = arith.constant 0 : i32
    %c0_i32_0 = arith.constant 0 : i32
    %c0_i32_1 = arith.constant 0 : i32
    return %c0_i32, %c0_i32_0 : i32, i32
  }
}

module attributes {stable_mosaic.version = 11 : i64} {
  func.func @kernel(%arg0: i32, %arg1: memref<288x256xf32, #tpu.memory_space<vmem>>, %arg2: memref<16x288xf32, #tpu.memory_space<vmem>>, %arg3: memref<16x1xf32, #tpu.memory_space<vmem>>, %arg4: memref<16x256xf32, #tpu.memory_space<vmem>>) attributes {dimension_semantics = [#tpu.dimension_semantics<parallel>], iteration_bounds = array<i64: 1>, scalar_prefetch = 0 : i64, scratch_operands = 0 : i64, tpu.core_type = #tpu.core_type<tc>, window_params = [{transform_indices = @transform_0, window_bounds = array<i64: 288, 256>}, {pipeline_mode = #tpu.pipeline_mode<synchronous>, transform_indices = @transform_1, window_bounds = array<i64: 16, 288>}, {pipeline_mode = #tpu.pipeline_mode<synchronous>, transform_indices = @transform_2, window_bounds = array<i64: 16, 1>}, {transform_indices = @transform_3, window_bounds = array<i64: 16, 256>}]} {
    %c0 = arith.constant 0 : index
    %c0_0 = arith.constant 0 : index
    %0 = vector.load %arg2[%c0, %c0_0] : memref<16x288xf32, #tpu.memory_space<vmem>>, vector<16x288xf32>
    %c0_1 = arith.constant 0 : index
    %c0_2 = arith.constant 0 : index
    %1 = vector.load %arg1[%c0_1, %c0_2] : memref<288x256xf32, #tpu.memory_space<vmem>>, vector<288x256xf32>
    %cst = arith.constant dense<0.000000e+00> : vector<16x256xf32>
    %2 = tpu.matmul %0, %1, %cst {dimension_numbers = #tpu.dot_dimension_numbers<[1], [0], [0], [1], [0, 0, 1, 1], [], []>} : vector<16x288xf32>, vector<288x256xf32>, vector<16x256xf32> -> vector<16x256xf32>
    %c0_3 = arith.constant 0 : index
    %c0_4 = arith.constant 0 : index
    %3 = vector.load %arg3[%c0_3, %c0_4] : memref<16x1xf32, #tpu.memory_space<vmem>>, vector<16x1xf32>
    %4 = vector.broadcast %3 : vector<16x1xf32> to vector<16x256xf32>
    %5 = arith.addf %2, %4 : vector<16x256xf32>
    %cst_5 = arith.constant 0.000000e+00 : f32
    %6 = vector.broadcast %cst_5 : f32 to vector<16x256xf32>
    %7 = arith.maximumf %5, %6 : vector<16x256xf32>
    %c0_6 = arith.constant 0 : index
    %c0_7 = arith.constant 0 : index
    %8 = vector.load %arg4[%c0_6, %c0_7] : memref<16x256xf32, #tpu.memory_space<vmem>>, vector<16x256xf32>
    tpu.vector_store %arg4[%c0_6, %c0_7], %7 {strides = array<i32>} : memref<16x256xf32, #tpu.memory_space<vmem>>, vector<16x256xf32>,
    return
  }
  func.func @transform_0(%arg0: i32) -> (i32, i32) {
    %c0_i32 = arith.constant 0 : i32
    %c0_i32_0 = arith.constant 0 : i32
    return %c0_i32, %arg0 : i32, i32
  }
  func.func @transform_1(%arg0: i32) -> (i32, i32) {
    %c0_i32 = arith.constant 0 : i32
    %c0_i32_0 = arith.constant 0 : i32
    %c0_i32_1 = arith.constant 0 : i32
    return %c0_i32, %c0_i32_0 : i32, i32
  }
  func.func @transform_2(%arg0: i32) -> (i32, i32) {
    %c0_i32 = arith.constant 0 : i32
    %c0_i32_0 = arith.constant 0 : i32
    %c0_i32_1 = arith.constant 0 : i32
    return %c0_i32, %c0_i32_0 : i32, i32
  }
  func.func @transform_3(%arg0: i32) -> (i32, i32) {
    %c0_i32 = arith.constant 0 : i32
    %c0_i32_0 = arith.constant 0 : i32
    return %c0_i32, %arg0 : i32, i32
  }
}

module attributes {stable_mosaic.version = 11 : i64} {
  func.func @kernel(%arg0: i32, %arg1: memref<144x384xf32, #tpu.memory_space<vmem>>, %arg2: memref<8x144xf32, #tpu.memory_space<vmem>>, %arg3: memref<8x1xf32, #tpu.memory_space<vmem>>, %arg4: memref<8x384xf32, #tpu.memory_space<vmem>>) attributes {dimension_semantics = [#tpu.dimension_semantics<parallel>], iteration_bounds = array<i64: 1>, scalar_prefetch = 0 : i64, scratch_operands = 0 : i64, tpu.core_type = #tpu.core_type<tc>, window_params = [{transform_indices = @transform_0, window_bounds = array<i64: 144, 384>}, {pipeline_mode = #tpu.pipeline_mode<synchronous>, transform_indices = @transform_1, window_bounds = array<i64: 8, 144>}, {pipeline_mode = #tpu.pipeline_mode<synchronous>, transform_indices = @transform_2, window_bounds = array<i64: 8, 1>}, {transform_indices = @transform_3, window_bounds = array<i64: 8, 384>}]} {
    %c0 = arith.constant 0 : index
    %c0_0 = arith.constant 0 : index
    %0 = vector.load %arg2[%c0, %c0_0] : memref<8x144xf32, #tpu.memory_space<vmem>>, vector<8x144xf32>
    %c0_1 = arith.constant 0 : index
    %c0_2 = arith.constant 0 : index
    %1 = vector.load %arg1[%c0_1, %c0_2] : memref<144x384xf32, #tpu.memory_space<vmem>>, vector<144x384xf32>
    %cst = arith.constant dense<0.000000e+00> : vector<8x384xf32>
    %2 = tpu.matmul %0, %1, %cst {dimension_numbers = #tpu.dot_dimension_numbers<[1], [0], [0], [1], [0, 0, 1, 1], [], []>} : vector<8x144xf32>, vector<144x384xf32>, vector<8x384xf32> -> vector<8x384xf32>
    %c0_3 = arith.constant 0 : index
    %c0_4 = arith.constant 0 : index
    %3 = vector.load %arg3[%c0_3, %c0_4] : memref<8x1xf32, #tpu.memory_space<vmem>>, vector<8x1xf32>
    %4 = vector.broadcast %3 : vector<8x1xf32> to vector<8x384xf32>
    %5 = arith.addf %2, %4 : vector<8x384xf32>
    %cst_5 = arith.constant 0.000000e+00 : f32
    %6 = vector.broadcast %cst_5 : f32 to vector<8x384xf32>
    %7 = arith.maximumf %5, %6 : vector<8x384xf32>
    %c0_6 = arith.constant 0 : index
    %c0_7 = arith.constant 0 : index
    %8 = vector.load %arg4[%c0_6, %c0_7] : memref<8x384xf32, #tpu.memory_space<vmem>>, vector<8x384xf32>
    tpu.vector_store %arg4[%c0_6, %c0_7], %7 {strides = array<i32>} : memref<8x384xf32, #tpu.memory_space<vmem>>, vector<8x384xf32>,
    return
  }
  func.func @transform_0(%arg0: i32) -> (i32, i32) {
    %c0_i32 = arith.constant 0 : i32
    %c0_i32_0 = arith.constant 0 : i32
    return %c0_i32, %arg0 : i32, i32
  }
  func.func @transform_1(%arg0: i32) -> (i32, i32) {
    %c0_i32 = arith.constant 0 : i32
    %c0_i32_0 = arith.constant 0 : i32
    %c0_i32_1 = arith.constant 0 : i32
    return %c0_i32, %c0_i32_0 : i32, i32
  }
  func.func @transform_2(%arg0: i32) -> (i32, i32) {
    %c0_i32 = arith.constant 0 : i32
    %c0_i32_0 = arith.constant 0 : i32
    %c0_i32_1 = arith.constant 0 : i32
    return %c0_i32, %c0_i32_0 : i32, i32
  }
  func.func @transform_3(%arg0: i32) -> (i32, i32) {
    %c0_i32 = arith.constant 0 : i32
    %c0_i32_0 = arith.constant 0 : i32
    return %c0_i32, %arg0 : i32, i32
  }
}

module attributes {stable_mosaic.version = 11 : i64} {
  func.func @kernel(%arg0: i32, %arg1: memref<72x1408xf32, #tpu.memory_space<vmem>>, %arg2: memref<4x72xf32, #tpu.memory_space<vmem>>, %arg3: memref<4x1xf32, #tpu.memory_space<vmem>>, %arg4: memref<4x1408xf32, #tpu.memory_space<vmem>>) attributes {dimension_semantics = [#tpu.dimension_semantics<parallel>], iteration_bounds = array<i64: 1>, scalar_prefetch = 0 : i64, scratch_operands = 0 : i64, tpu.core_type = #tpu.core_type<tc>, window_params = [{transform_indices = @transform_0, window_bounds = array<i64: 72, 1408>}, {pipeline_mode = #tpu.pipeline_mode<synchronous>, transform_indices = @transform_1, window_bounds = array<i64: 4, 72>}, {pipeline_mode = #tpu.pipeline_mode<synchronous>, transform_indices = @transform_2, window_bounds = array<i64: 4, 1>}, {transform_indices = @transform_3, window_bounds = array<i64: 4, 1408>}]} {
    %c0 = arith.constant 0 : index
    %c0_0 = arith.constant 0 : index
    %0 = vector.load %arg2[%c0, %c0_0] : memref<4x72xf32, #tpu.memory_space<vmem>>, vector<4x72xf32>
    %c0_1 = arith.constant 0 : index
    %c0_2 = arith.constant 0 : index
    %1 = vector.load %arg1[%c0_1, %c0_2] : memref<72x1408xf32, #tpu.memory_space<vmem>>, vector<72x1408xf32>
    %cst = arith.constant dense<0.000000e+00> : vector<4x1408xf32>
    %2 = tpu.matmul %0, %1, %cst {dimension_numbers = #tpu.dot_dimension_numbers<[1], [0], [0], [1], [0, 0, 1, 1], [], []>} : vector<4x72xf32>, vector<72x1408xf32>, vector<4x1408xf32> -> vector<4x1408xf32>
    %c0_3 = arith.constant 0 : index
    %c0_4 = arith.constant 0 : index
    %3 = vector.load %arg3[%c0_3, %c0_4] : memref<4x1xf32, #tpu.memory_space<vmem>>, vector<4x1xf32>
    %4 = vector.broadcast %3 : vector<4x1xf32> to vector<4x1408xf32>
    %5 = arith.addf %2, %4 : vector<4x1408xf32>
    %cst_5 = arith.constant 0.000000e+00 : f32
    %6 = vector.broadcast %cst_5 : f32 to vector<4x1408xf32>
    %7 = arith.maximumf %5, %6 : vector<4x1408xf32>
    %c0_6 = arith.constant 0 : index
    %c0_7 = arith.constant 0 : index
    %8 = vector.load %arg4[%c0_6, %c0_7] : memref<4x1408xf32, #tpu.memory_space<vmem>>, vector<4x1408xf32>
    tpu.vector_store %arg4[%c0_6, %c0_7], %7 {strides = array<i32>} : memref<4x1408xf32, #tpu.memory_space<vmem>>, vector<4x1408xf32>,
    return
  }
  func.func @transform_0(%arg0: i32) -> (i32, i32) {
    %c0_i32 = arith.constant 0 : i32
    %c0_i32_0 = arith.constant 0 : i32
    return %c0_i32, %arg0 : i32, i32
  }
  func.func @transform_1(%arg0: i32) -> (i32, i32) {
    %c0_i32 = arith.constant 0 : i32
    %c0_i32_0 = arith.constant 0 : i32
    %c0_i32_1 = arith.constant 0 : i32
    return %c0_i32, %c0_i32_0 : i32, i32
  }
  func.func @transform_2(%arg0: i32) -> (i32, i32) {
    %c0_i32 = arith.constant 0 : i32
    %c0_i32_0 = arith.constant 0 : i32
    %c0_i32_1 = arith.constant 0 : i32
    return %c0_i32, %c0_i32_0 : i32, i32
  }
  func.func @transform_3(%arg0: i32) -> (i32, i32) {
    %c0_i32 = arith.constant 0 : i32
    %c0_i32_0 = arith.constant 0 : i32
    return %c0_i32, %arg0 : i32, i32
  }
}

module attributes {stable_mosaic.version = 11 : i64} {
  func.func @kernel(%arg0: i32, %arg1: memref<36x1664xf32, #tpu.memory_space<vmem>>, %arg2: memref<1x36xf32, #tpu.memory_space<vmem>>, %arg3: memref<1x1xf32, #tpu.memory_space<vmem>>, %arg4: memref<1x1664xf32, #tpu.memory_space<vmem>>) attributes {dimension_semantics = [#tpu.dimension_semantics<parallel>], iteration_bounds = array<i64: 1>, scalar_prefetch = 0 : i64, scratch_operands = 0 : i64, tpu.core_type = #tpu.core_type<tc>, window_params = [{transform_indices = @transform_0, window_bounds = array<i64: 36, 1664>}, {pipeline_mode = #tpu.pipeline_mode<synchronous>, transform_indices = @transform_1, window_bounds = array<i64: 1, 36>}, {pipeline_mode = #tpu.pipeline_mode<synchronous>, transform_indices = @transform_2, window_bounds = array<i64: 1, 1>}, {transform_indices = @transform_3, window_bounds = array<i64: 1, 1664>}]} {
    %c0 = arith.constant 0 : index
    %c0_0 = arith.constant 0 : index
    %0 = vector.load %arg2[%c0, %c0_0] : memref<1x36xf32, #tpu.memory_space<vmem>>, vector<1x36xf32>
    %c0_1 = arith.constant 0 : index
    %c0_2 = arith.constant 0 : index
    %1 = vector.load %arg1[%c0_1, %c0_2] : memref<36x1664xf32, #tpu.memory_space<vmem>>, vector<36x1664xf32>
    %cst = arith.constant dense<0.000000e+00> : vector<1x1664xf32>
    %2 = tpu.matmul %0, %1, %cst {dimension_numbers = #tpu.dot_dimension_numbers<[1], [0], [0], [1], [0, 0, 1, 1], [], []>} : vector<1x36xf32>, vector<36x1664xf32>, vector<1x1664xf32> -> vector<1x1664xf32>
    %c0_3 = arith.constant 0 : index
    %c0_4 = arith.constant 0 : index
    %3 = vector.load %arg3[%c0_3, %c0_4] : memref<1x1xf32, #tpu.memory_space<vmem>>, vector<1x1xf32>
    %4 = vector.broadcast %3 : vector<1x1xf32> to vector<1x1664xf32>
    %5 = arith.addf %2, %4 : vector<1x1664xf32>
    %6 = arith.negf %5 : vector<1x1664xf32>
    %7 = math.exp %6 : vector<1x1664xf32>
    %cst_5 = arith.constant 1.000000e+00 : f32
    %8 = vector.broadcast %cst_5 : f32 to vector<1x1664xf32>
    %9 = arith.addf %8, %7 : vector<1x1664xf32>
    %10 = arith.divf %8, %9 : vector<1x1664xf32>
    %c0_6 = arith.constant 0 : index
    %c0_7 = arith.constant 0 : index
    %11 = vector.load %arg4[%c0_6, %c0_7] : memref<1x1664xf32, #tpu.memory_space<vmem>>, vector<1x1664xf32>
    tpu.vector_store %arg4[%c0_6, %c0_7], %10 {strides = array<i32>} : memref<1x1664xf32, #tpu.memory_space<vmem>>, vector<1x1664xf32>,
    return
  }
  func.func @transform_0(%arg0: i32) -> (i32, i32) {
    %c0_i32 = arith.constant 0 : i32
    %c0_i32_0 = arith.constant 0 : i32
    return %c0_i32, %arg0 : i32, i32
  }
  func.func @transform_1(%arg0: i32) -> (i32, i32) {
    %c0_i32 = arith.constant 0 : i32
    %c0_i32_0 = arith.constant 0 : i32
    %c0_i32_1 = arith.constant 0 : i32
    return %c0_i32, %c0_i32_0 : i32, i32
  }
  func.func @transform_2(%arg0: i32) -> (i32, i32) {
    %c0_i32 = arith.constant 0 : i32
    %c0_i32_0 = arith.constant 0 : i32
    %c0_i32_1 = arith.constant 0 : i32
    return %c0_i32, %c0_i32_0 : i32, i32
  }
  func.func @transform_3(%arg0: i32) -> (i32, i32) {
    %c0_i32 = arith.constant 0 : i32
    %c0_i32_0 = arith.constant 0 : i32
    return %c0_i32, %arg0 : i32, i32
  }
}

</mosaic_0001>

<bundles_post_ra>
// kernel: generator_forward.5
= control target key start
LH: loop header
LB: loop body
LE: loop exit
PB: predicated region body
PF: predicated region fallthrough
CT: control target
= control target key end

     0   :  { %8 = vsyncpa [#allocation3], 0  ;;  %s272_s12 = smov [#allocation2]   ;;  %s318_s0 = inlined_call_operand.vmem [shape: f32[2,16], index: 0, kind: input, shape index: {}]   ;;  %s319_s1 = inlined_call_operand.hbm [shape: f32[16,512], index: 1, kind: input, shape index: {}]   ;;  %s320_s2 = inlined_call_operand.vmem [shape: f32[1,512], index: 2, kind: input, shape index: {}]   ;;  %s321_s3 = inlined_call_operand.vmem [shape: f32[2,512], index: 3, kind: output, shape index: {}]  }
   0x1   :  { %s16_s13 = sshll.u32 %s272_s12, 4  ;;  %s248_s16 = scalar_lea.hbm %s319_s1, 1024  ;;  %s17_s13 = int_to_ptr.vmem [resolvable:$true] %s16_s13 }
   0x2   :  { %p249_p0 = scmp.ne.s32.totalorder %s319_s1, %s248_s16  ;;  %p252_p1 = scmp.lt.u32.totalorder %s248_s16, %s319_s1 }
   0x4   :  { %p254_p2 = pnand %p252_p1, %p249_p0 }
   0x6   :  { %257 = shalt.err (!%p254_p2)
}
   0x7   :  { %s258_s21 = scalar_lea.vmem %s17_s13, 1024  ;;  %p263_p4 = scmp.lt.s32.totalorder %s17_s13, %s17_s13 }
   0x8   :  { %p259_p3 = scmp.ne.s32.totalorder %s17_s13, %s258_s21  ;;  %p264_p5 = scmp.lt.s32.totalorder %s258_s21, %s258_s21 }
   0xa   :  { %p265_p6 = por %p264_p5, %p263_p4 }
   0xc   :  { %p266_p7 = pnand %p265_p6, %p259_p3 }
   0xe   :  { %269 = shalt.err (!%p266_p7)
}
   0xf   :  { %s273_s22 = smov 512   ;;  %s274_s23 = smov 32  }
  0x10   :  { %22 = dma.hbm_to_vmem [thread:$0]  %s319_s1, 1024, %s17_s13, [#allocation3], %s273_s22, %s273_s22, %s274_s23  }
  0x11   :  { %270 = dma.done.wait [#allocation3], 1024  }
  0x12   :  { %271 = vsyncadd [#allocation3], 4294966272  ;;  %v275_v0 = vmov 0.0   ;;  %v30_v1 = vld [vmem:[#allocation2 + $0x8] sm:$0xff]  ;;  %v32_v3 = vld [vmem:[#allocation2 + $0x18] sm:$0xff]  ;;  %vm59_vm0 = vcmask 130048   ;;  %v39_v14 = vlaneseq }
  0x13   :  { %127 = vmatprep.mubr.f32.mxu0 %v275_v0  ;;  %198 = vmatprep.mubr.f32.mxu1 %v275_v0  ;;  %v34_v2 = vld [vmem:[#allocation2 + $0x28] sm:$0xff]  ;;  %v36_v5 = vld [vmem:[#allocation2 + $0x38] sm:$0xff]  ;;  %v29_v6 = vld [vmem:[#allocation2] sm:$0xff]  ;;  %v276_v20 = vmov 1983009808  }
  0x14   :  { %v235_v4 = vpack.c.bf16 %v34_v2, %v30_v1  ;;  %v33_v7 = vld [vmem:[#allocation2 + $0x20] sm:$0xff]  ;;  %v239_v8 = vpack.c.bf16 %v36_v5, %v32_v3  ;;  %v31_v10 = vld [vmem:[#allocation2 + $0x10] sm:$0xff]  ;;  %v40_v15 = vshrl.u32 %v39_v14, 7  ;;  %v212_v21 = vunpack.c.l.s4 %v276_v20 }
  0x15   :  { %v237_v9 = vpack.c.bf16 %v33_v7, %v29_v6  ;;  %v35_v11 = vld [vmem:[#allocation2 + $0x30] sm:$0xff]  ;;  %v28_v13 = vld [vmem:[%s318_s0] sm:$0x3] }
  0x16   :  { %236 = vmatprep.subr.bf16.mxu0 %v235_v4  ;;  %v241_v12 = vpack.c.bf16 %v35_v11, %v31_v10  ;;  %240 = vmatprep.subr.bf16.mxu1 %v239_v8  ;;  %v41_v16 = vsub.s32 0, %v40_v15  ;;  %v37_v17 = vld [vmem:[%s320_s2] sm:$0xf]  ;;  %v49_v18 = vsub.s32 2, %v40_v15  ;;  %v45_v19 = vsub.s32 1, %v40_v15 }
  0x17   :  { %238 = vmatpush1.bf16.msra.mxu0 %v237_v9  ;;  %v53_v22 = vsub.s32 3, %v40_v15  ;;  %v213_v26 = vunpack.c.0.s8 %v212_v21 }
  0x18   :  { %242 = vmatpush1.bf16.msra.mxu1 %v241_v12  ;;  %v42_v23 = vrot.slane %v37_v17, %v41_v16  ;;  %v50_v24 = vrot.slane %v37_v17, %v49_v18  ;;  %v46_v25 = vrot.slane %v37_v17, %v45_v19 }
  0x19   :  { %v54_v27 = vrot.slane %v37_v17, %v53_v22  ;;  %v216_v34 = vsub.s32 %v213_v26, %v40_v15 }
  0x1a   :  { %233 = vmatmul.mubr.msk.f32.vlgmr.msra.gmra.mrb[0].mxu0 %vm59_vm0, %v28_v13 }
  0x1b   :  { %234 = vmatmul.mubr.msk.f32.vlgmr.msra.gmra.mrb[0].mxu1 %vm59_vm0, %v28_v13 }
  0xed   :  { %v129_v28 = vpop.f32.mrb[0].mxu0 }
  0xee   :  { %v130_v29 = vadd.f32 %v129_v28, %v42_v23  ;;  %v200_v30 = vpop.f32.mrb[0].mxu1  ;;  %v131_v31 = vpop.f32.mrb[1].mxu0 }
  0xef   :  { %v201_v32 = vadd.f32 %v200_v30, %v50_v24  ;;  %v132_v33 = vadd.f32 %v131_v31, %v46_v25  ;;  %v202_v35 = vpop.f32.mrb[1].mxu1 }
  0xf0   :  { %v203_v36 = vadd.f32 %v202_v35, %v54_v27 }
  0xf1   :  { %v209_v37 = vcombine.low %v130_v29, %v132_v33 }
  0xf2   :  { %v210_v38 = vcombine.low %v201_v32, %v203_v36 }
  0xf3   :  { %v217_v39 = vrot.slane %v209_v37, %v216_v34 }
  0xf4   :  { %v224_v40 = vrot.slane %v210_v38, %v216_v34 }
  0xf6   :  { %v225_v41 = vcombine.low %v217_v39, %v224_v40 }
  0xf8   :  { %227 = vst [vmem:[%s321_s3] sm:$0xff] %v225_v41 }
  0xf9   :  { %232 = vsyncpa [#allocation3], 1 }

// kernel: generator_forward.6
= control target key start
LH: loop header
LB: loop body
LE: loop exit
PB: predicated region body
PF: predicated region fallthrough
CT: control target
= control target key end

     0   :  { %v362_v3 = vmov 0.0   ;;  %v363_v4 = vmov 0   ;;  %vm104_vm0 = vcmask 261120   ;;  %s640_s0 = inlined_call_operand.vmem [shape: f32[288,256], index: 0, kind: input, shape index: {}]   ;;  %s641_s1 = inlined_call_operand.vmem [shape: f32[16,288], index: 1, kind: input, shape index: {}]   ;;  %s642_s2 = inlined_call_operand.vmem [shape: f32[16,1], index: 2, kind: input, shape index: {}]   ;;  %s643_s3 = inlined_call_operand.vmem [shape: f32[16,256], index: 3, kind: output, shape index: {}]  }
   0x1   :  { %v21_v0 = vld [vmem:[%s640_s0 + $0x8] sm:$0xff]  ;;  %v23_v1 = vld [vmem:[%s640_s0 + $0x18] sm:$0xff]  ;;  %v20_v2 = vld [vmem:[%s640_s0] sm:$0xff]  ;;  %252 = vmatprep.mubr.f32.mxu0 %v362_v3  ;;  %361 = vset.pattern.permute.xlu0 %v363_v4 }
   0x2   :  { %v279_v5 = vpack.c.bf16 %v23_v1, %v21_v0  ;;  %v22_v6 = vld [vmem:[%s640_s0 + $0x10] sm:$0xff]  ;;  %v25_v7 = vld [vmem:[%s640_s0 + $0x28] sm:$0xff]  ;;  %v27_v8 = vld [vmem:[%s640_s0 + $0x38] sm:$0xff] }
   0x3   :  { %v281_v9 = vpack.c.bf16 %v22_v6, %v20_v2  ;;  %v283_v10 = vpack.c.bf16 %v27_v8, %v25_v7  ;;  %v24_v11 = vld [vmem:[%s640_s0 + $0x20] sm:$0xff]  ;;  %v26_v12 = vld [vmem:[%s640_s0 + $0x30] sm:$0xff]  ;;  %v29_v13 = vld [vmem:[%s640_s0 + $0x48] sm:$0xff] }
   0x4   :  { %280 = vmatprep.subr.bf16.mxu1 %v279_v5  ;;  %v31_v14 = vld [vmem:[%s640_s0 + $0x58] sm:$0xff]  ;;  %v285_v15 = vpack.c.bf16 %v26_v12, %v24_v11  ;;  %v28_v17 = vld [vmem:[%s640_s0 + $0x40] sm:$0xff]  ;;  %v30_v18 = vld [vmem:[%s640_s0 + $0x50] sm:$0xff] }
   0x5   :  { %282 = vmatpush1.bf16.msra.mxu1 %v281_v9  ;;  %v287_v16 = vpack.c.bf16 %v31_v14, %v29_v13  ;;  %v33_v19 = vld [vmem:[%s640_s0 + $0x68] sm:$0xff]  ;;  %v35_v20 = vld [vmem:[%s640_s0 + $0x78] sm:$0xff]  ;;  %v289_v21 = vpack.c.bf16 %v30_v18, %v28_v17  ;;  %v32_v23 = vld [vmem:[%s640_s0 + $0x60] sm:$0xff] }
   0x6   :  { %284 = vmatprep.subr.bf16.mxu1 %v283_v10  ;;  %v291_v22 = vpack.c.bf16 %v35_v20, %v33_v19  ;;  %v34_v24 = vld [vmem:[%s640_s0 + $0x70] sm:$0xff]  ;;  %v37_v25 = vld [vmem:[%s640_s0 + $0x88] sm:$0xff]  ;;  %v39_v26 = vld [vmem:[%s640_s0 + $0x98] sm:$0xff] }
   0x7   :  { %v293_v27 = vpack.c.bf16 %v34_v24, %v32_v23  ;;  %v295_v28 = vpack.c.bf16 %v39_v26, %v37_v25  ;;  %v36_v29 = vld [vmem:[%s640_s0 + $0x80] sm:$0xff]  ;;  %v38_v30 = vld [vmem:[%s640_s0 + $0x90] sm:$0xff]  ;;  %v41_v31 = vld [vmem:[%s640_s0 + $0xa8] sm:$0xff] }
   0x8   :  { %v43_v32 = vld [vmem:[%s640_s0 + $0xb8] sm:$0xff]  ;;  %v297_v33 = vpack.c.bf16 %v38_v30, %v36_v29  ;;  %v40_v35 = vld [vmem:[%s640_s0 + $0xa0] sm:$0xff]  ;;  %v42_v36 = vld [vmem:[%s640_s0 + $0xb0] sm:$0xff] }
   0x9   :  { %286 = vmatpush1.bf16.msra.mxu1 %v285_v15  ;;  %v299_v34 = vpack.c.bf16 %v43_v32, %v41_v31  ;;  %v45_v37 = vld [vmem:[%s640_s0 + $0xc8] sm:$0xff]  ;;  %v47_v38 = vld [vmem:[%s640_s0 + $0xd8] sm:$0xff]  ;;  %v301_v39 = vpack.c.bf16 %v42_v36, %v40_v35  ;;  %v84_v42 = vld [vmem:[%s640_s0 + $0x200] sm:$0xff] }
   0xa   :  { %288 = vmatprep.subr.bf16.mxu1 %v287_v16  ;;  %v85_v40 = vld [vmem:[%s640_s0 + $0x208] sm:$0xff]  ;;  %v87_v41 = vld [vmem:[%s640_s0 + $0x218] sm:$0xff]  ;;  %v303_v43 = vpack.c.bf16 %v47_v38, %v45_v37  ;;  %v44_v44 = vld [vmem:[%s640_s0 + $0xc0] sm:$0xff] }
   0xb   :  { %v46_v45 = vld [vmem:[%s640_s0 + $0xd0] sm:$0xff]  ;;  %v343_v46 = vpack.c.bf16 %v87_v41, %v85_v40  ;;  %v49_v48 = vld [vmem:[%s640_s0 + $0xe8] sm:$0xff]  ;;  %v51_v49 = vld [vmem:[%s640_s0 + $0xf8] sm:$0xff] }
   0xc   :  { %v86_v47 = vld [vmem:[%s640_s0 + $0x210] sm:$0xff]  ;;  %v89_v51 = vld [vmem:[%s640_s0 + $0x228] sm:$0xff]  ;;  %v91_v52 = vld [vmem:[%s640_s0 + $0x238] sm:$0xff]  ;;  %v305_v55 = vpack.c.bf16 %v46_v45, %v44_v44  ;;  %v307_v59 = vpack.c.bf16 %v51_v49, %v49_v48 }
   0xd   :  { %290 = vmatpush1.bf16.msra.mxu1 %v289_v21  ;;  %v345_v50 = vpack.c.bf16 %v86_v47, %v84_v42  ;;  %344 = vmatprep.subr.bf16.mxu0 %v343_v46  ;;  %v88_v53 = vld [vmem:[%s640_s0 + $0x220] sm:$0xff]  ;;  %v90_v54 = vld [vmem:[%s640_s0 + $0x230] sm:$0xff]  ;;  %v347_v56 = vpack.c.bf16 %v91_v52, %v89_v51  ;;  %v15_v58 = vld [vmem:[%s641_s1 + $0x8] sm:$0xff] }
   0xe   :  { %292 = vmatprep.subr.bf16.mxu1 %v291_v22  ;;  %v349_v57 = vpack.c.bf16 %v90_v54, %v88_v53  ;;  %v48_v60 = vld [vmem:[%s640_s0 + $0xe0] sm:$0xff]  ;;  %v50_v61 = vld [vmem:[%s640_s0 + $0xf0] sm:$0xff]  ;;  %175 = vmatprep.mubr.f32.mxu1 %v15_v58  ;;  %v53_v62 = vld [vmem:[%s640_s0 + $0x108] sm:$0xff] }
   0xf   :  { %346 = vmatpush1.bf16.msra.mxu0 %v345_v50  ;;  %v55_v63 = vld [vmem:[%s640_s0 + $0x118] sm:$0xff]  ;;  %v92_v0 = vld [vmem:[%s642_s2] sm:$0xff]  ;;  %v309_v1 = vpack.c.bf16 %v50_v61, %v48_v60  ;;  %v16_v2 = vld [vmem:[%s641_s1 + $0x10] sm:$0xff] }
  0x10   :  { %348 = vmatprep.subr.bf16.mxu0 %v347_v56  ;;  %96 = vperm.xlu0 %361, %v92_v0   ;;  %v93_v4 = vld [vmem:[%s642_s2 + $0x8] sm:$0xff]  ;;  %v311_v5 = vpack.c.bf16 %v55_v63, %v53_v62  ;;  %v52_v6 = vld [vmem:[%s640_s0 + $0x100] sm:$0xff]  ;;  %v54_v7 = vld [vmem:[%s640_s0 + $0x110] sm:$0xff] }
  0x11   :  { %294 = vmatpush1.bf16.msra.mxu1 %v293_v27  ;;  %v57_v8 = vld [vmem:[%s640_s0 + $0x128] sm:$0xff]  ;;  %v59_v9 = vld [vmem:[%s640_s0 + $0x138] sm:$0xff]  ;;  %v313_v10 = vpack.c.bf16 %v54_v7, %v52_v6  ;;  %v56_v13 = vld [vmem:[%s640_s0 + $0x120] sm:$0xff] }
  0x12   :  { %296 = vmatprep.subr.bf16.mxu1 %v295_v28  ;;  %v19_v11 = vld [vmem:[%s641_s1 + $0x28] sm:$0xff]  ;;  %v315_v12 = vpack.c.bf16 %v59_v9, %v57_v8  ;;  %v58_v14 = vld [vmem:[%s640_s0 + $0x130] sm:$0xff]  ;;  %v60_v18 = vld [vmem:[%s640_s0 + $0x140] sm:$0xff] }
  0x13   :  { %350 = vmatpush1.bf16.msra.mxu0 %v349_v57  ;;  %v61_v15 = vld [vmem:[%s640_s0 + $0x148] sm:$0xff]  ;;  %v317_v16 = vpack.c.bf16 %v58_v14, %v56_v13  ;;  %v62_v19 = vld [vmem:[%s640_s0 + $0x150] sm:$0xff]  ;;  %v67_v21 = vld [vmem:[%s640_s0 + $0x178] sm:$0xff] }
  0x14   :  { %101 = vperm.xlu0 %361, %v93_v4   ;;  %v65_v20 = vld [vmem:[%s640_s0 + $0x168] sm:$0xff]  ;;  %v321_v22 = vpack.c.bf16 %v62_v19, %v60_v18  ;;  %v64_v24 = vld [vmem:[%s640_s0 + $0x160] sm:$0xff]  ;;  %v66_v25 = vld [vmem:[%s640_s0 + $0x170] sm:$0xff] }
  0x15   :  { %298 = vmatpush1.bf16.msra.mxu1 %v297_v33  ;;  %v323_v23 = vpack.c.bf16 %v67_v21, %v65_v20  ;;  %v69_v26 = vld [vmem:[%s640_s0 + $0x188] sm:$0xff]  ;;  %v71_v27 = vld [vmem:[%s640_s0 + $0x198] sm:$0xff]  ;;  %v325_v28 = vpack.c.bf16 %v66_v25, %v64_v24  ;;  %v68_v30 = vld [vmem:[%s640_s0 + $0x180] sm:$0xff] }
  0x16   :  { %300 = vmatprep.subr.bf16.mxu1 %v299_v34  ;;  %277 = vmatmul.mubr.msk.f32.vlgmr.msra.gmra.mrb[0].mxu0 %vm104_vm0, %v16_v2  ;;  %v327_v29 = vpack.c.bf16 %v71_v27, %v69_v26  ;;  %v70_v31 = vld [vmem:[%s640_s0 + $0x190] sm:$0xff]  ;;  %v73_v32 = vld [vmem:[%s640_s0 + $0x1a8] sm:$0xff]  ;;  %v75_v33 = vld [vmem:[%s640_s0 + $0x1b8] sm:$0xff] }
  0x17   :  { %258 = vmatprep.mubr.f32.mxu0 %v362_v3  ;;  %v63_v3 = vld [vmem:[%s640_s0 + $0x158] sm:$0xff]  ;;  %v329_v34 = vpack.c.bf16 %v70_v31, %v68_v30  ;;  %v331_v35 = vpack.c.bf16 %v75_v33, %v73_v32  ;;  %v72_v36 = vld [vmem:[%s640_s0 + $0x1a0] sm:$0xff]  ;;  %v74_v37 = vld [vmem:[%s640_s0 + $0x1b0] sm:$0xff] }
  0x18   :  { %v319_v17 = vpack.c.bf16 %v63_v3, %v61_v15  ;;  %v77_v38 = vld [vmem:[%s640_s0 + $0x1c8] sm:$0xff]  ;;  %v333_v40 = vpack.c.bf16 %v74_v37, %v72_v36  ;;  %v76_v42 = vld [vmem:[%s640_s0 + $0x1c0] sm:$0xff]  ;;  %v83_v45 = vld [vmem:[%s640_s0 + $0x1f8] sm:$0xff] }
  0x19   :  { %302 = vmatpush1.bf16.msra.mxu1 %v301_v39  ;;  %v79_v39 = vld [vmem:[%s640_s0 + $0x1d8] sm:$0xff]  ;;  %v81_v44 = vld [vmem:[%s640_s0 + $0x1e8] sm:$0xff]  ;;  %v80_v48 = vld [vmem:[%s640_s0 + $0x1e0] sm:$0xff] }
  0x1a   :  { %304 = vmatprep.subr.bf16.mxu1 %v303_v43  ;;  %278 = vmatmul.mubr.msk.f32.gmra.mrb[2].mxu0 %vm104_vm0, %v19_v11  ;;  %v335_v41 = vpack.c.bf16 %v79_v39, %v77_v38  ;;  %v78_v43 = vld [vmem:[%s640_s0 + $0x1d0] sm:$0xff]  ;;  %v339_v47 = vpack.c.bf16 %v83_v45, %v81_v44  ;;  %v14_v51 = vld [vmem:[%s641_s1] sm:$0xff]  ;;  %v17_v53 = vld [vmem:[%s641_s1 + $0x18] sm:$0xff] }
  0x1b   :  { %v337_v46 = vpack.c.bf16 %v78_v43, %v76_v42  ;;  %v82_v49 = vld [vmem:[%s640_s0 + $0x1f0] sm:$0xff]  ;;  %v18_v52 = vld [vmem:[%s641_s1 + $0x20] sm:$0xff] }
  0x1c   :  { %v341_v50 = vpack.c.bf16 %v82_v49, %v80_v48 }
  0x1d   :  { %306 = vmatpush1.bf16.msra.mxu1 %v305_v55 }
  0x1e   :  { %308 = vmatprep.subr.bf16.mxu1 %v307_v59 }
  0x21   :  { %310 = vmatpush1.bf16.msra.mxu1 %v309_v1 }
  0x22   :  { %312 = vmatprep.subr.bf16.mxu1 %v311_v5 }
  0x25   :  { %314 = vmatpush1.bf16.msra.mxu1 %v313_v10 }
  0x26   :  { %316 = vmatprep.subr.bf16.mxu1 %v315_v12 }
  0x29   :  { %318 = vmatpush1.bf16.msra.mxu1 %v317_v16 }
  0x2a   :  { %320 = vmatprep.subr.bf16.mxu1 %v319_v17 }
  0x2d   :  { %322 = vmatpush1.bf16.msra.mxu1 %v321_v22 }
  0x2e   :  { %324 = vmatprep.subr.bf16.mxu1 %v323_v23 }
  0x31   :  { %326 = vmatpush1.bf16.msra.mxu1 %v325_v28 }
  0x32   :  { %328 = vmatprep.subr.bf16.mxu1 %v327_v29 }
  0x35   :  { %330 = vmatpush1.bf16.msra.mxu1 %v329_v34 }
  0x36   :  { %332 = vmatprep.subr.bf16.mxu1 %v331_v35 }
  0x39   :  { %334 = vmatpush1.bf16.msra.mxu1 %v333_v40 }
  0x3a   :  { %336 = vmatprep.subr.bf16.mxu1 %v335_v41 }
  0x3d   :  { %338 = vmatpush1.bf16.msra.mxu1 %v337_v46 }
  0x3e   :  { %340 = vmatprep.subr.bf16.mxu1 %v339_v47 }
  0x41   :  { %342 = vmatpush1.bf16.msra.mxu1 %v341_v50 }
  0x44   :  { %176 = vmatmul.mubr.f32.vlgmr.msra.gmra.mrb[0].mxu1 %v14_v51 }
  0x45   :  { %181 = vmatprep.mubr.f32.mxu1 %v18_v52 }
  0x48   :  { %182 = vmatmul.mubr.f32.gmra.mrb[2].mxu1 %v17_v53 }
  0x8f   :  { %v97_v58 = vpop.permute.xlu0 %96 }
  0x93   :  { %v102_v0 = vpop.permute.xlu0 %101 }
  0xe9   :  { %v254_v54 = vpop.f32.mrb[0].mxu0 }
  0xea   :  { %v256_v55 = vpop.f32.mrb[1].mxu0 }
  0xed   :  { %v260_v56 = vpop.f32.mrb[2].mxu0 }
  0xee   :  { %v262_v57 = vpop.f32.mrb[3].mxu0 }
 0x117   :  { %v177_v59 = vpop.f32.mrb[0].mxu1 }
 0x118   :  { %v178_v60 = vadd.f32 %v177_v59, %v97_v58  ;;  %v179_v61 = vpop.f32.mrb[1].mxu1 }
 0x119   :  { %v180_v62 = vadd.f32 %v179_v61, %v97_v58 }
 0x11a   :  { %v255_v63 = vadd.f32 %v254_v54, %v178_v60 }
 0x11b   :  { %v257_v1 = vadd.f32 %v256_v55, %v180_v62  ;;  %v183_v2 = vpop.f32.mrb[2].mxu1 }
 0x11c   :  { %v265_v4 = vmax.f32 %v255_v63, 0.0  ;;  %v184_v5 = vadd.f32 %v183_v2, %v102_v0  ;;  %v185_v6 = vpop.f32.mrb[3].mxu1 }
 0x11d   :  { %v266_v7 = vmax.f32 %v257_v1, 0.0  ;;  %v186_v8 = vadd.f32 %v185_v6, %v102_v0 }
 0x11e   :  { %269 = vst [vmem:[%s643_s3] sm:$0xff] %v265_v4  ;;  %v261_v9 = vadd.f32 %v260_v56, %v184_v5 }
 0x11f   :  { %270 = vst [vmem:[%s643_s3 + $0x8] sm:$0xff] %v266_v7  ;;  %v263_v10 = vadd.f32 %v262_v57, %v186_v8 }
 0x120   :  { %v267_v11 = vmax.f32 %v261_v9, 0.0 }
 0x121   :  { %v268_v12 = vmax.f32 %v263_v10, 0.0 }
 0x122   :  { %271 = vst [vmem:[%s643_s3 + $0x10] sm:$0xff] %v267_v11 }
 0x123   :  { %272 = vst [vmem:[%s643_s3 + $0x18] sm:$0xff] %v268_v12 }

// kernel: generator_forward.7
= control target key start
LH: loop header
LB: loop body
LE: loop exit
PB: predicated region body
PF: predicated region fallthrough
CT: control target
= control target key end

     0   :  { %v299_v2 = vmov 0.0|0.0   ;;  %v300_v4 = vmov 0   ;;  %vm76_vm0 = vcmask 130048   ;;  %s510_s0 = inlined_call_operand.vmem [shape: f32[144,384], index: 0, kind: input, shape index: {}]   ;;  %s511_s1 = inlined_call_operand.vmem [shape: f32[8,144], index: 1, kind: input, shape index: {}]   ;;  %s512_s2 = inlined_call_operand.vmem [shape: f32[8,1], index: 2, kind: input, shape index: {}]   ;;  %s513_s3 = inlined_call_operand.vmem [shape: f32[8,384], index: 3, kind: output, shape index: {}]  }
   0x1   :  { %v17_v0 = vld [vmem:[%s510_s0 + $0x8] sm:$0xff]  ;;  %v20_v1 = vld [vmem:[%s510_s0 + $0x20] sm:$0xff]  ;;  %269 = vmatprep.subr.bf16.mxu1 %v299_v2  ;;  %298 = vset.pattern.permute.xlu0 %v300_v4  ;;  %v19_v6 = vld [vmem:[%s510_s0 + $0x18] sm:$0xff] }
   0x2   :  { %v16_v3 = vld [vmem:[%s510_s0] sm:$0xff]  ;;  %v233_v5 = vpack.c.bf16 %v20_v1, %v17_v0  ;;  %v18_v7 = vld [vmem:[%s510_s0 + $0x10] sm:$0xff]  ;;  %v21_v8 = vld [vmem:[%s510_s0 + $0x28] sm:$0xff] }
   0x3   :  { %v235_v9 = vpack.c.bf16 %v19_v6, %v16_v3  ;;  %v270_v10 = vpack.c.bf16 %v21_v8, %v18_v7  ;;  %v23_v11 = vld [vmem:[%s510_s0 + $0x38] sm:$0xff]  ;;  %v26_v12 = vld [vmem:[%s510_s0 + $0x50] sm:$0xff]  ;;  %v25_v15 = vld [vmem:[%s510_s0 + $0x48] sm:$0xff] }
   0x4   :  { %v22_v13 = vld [vmem:[%s510_s0 + $0x30] sm:$0xff]  ;;  %234 = vmatprep.subr.bf16.mxu0 %v233_v5  ;;  %v237_v14 = vpack.c.bf16 %v26_v12, %v23_v11  ;;  %v24_v16 = vld [vmem:[%s510_s0 + $0x40] sm:$0xff]  ;;  %v27_v17 = vld [vmem:[%s510_s0 + $0x58] sm:$0xff] }
   0x5   :  { %236 = vmatpush1.bf16.msra.mxu0 %v235_v9  ;;  %271 = vmatpush1.bf16.msra.mxu1 %v270_v10  ;;  %v239_v18 = vpack.c.bf16 %v25_v15, %v22_v13  ;;  %v273_v19 = vpack.c.bf16 %v27_v17, %v24_v16  ;;  %v29_v20 = vld [vmem:[%s510_s0 + $0x68] sm:$0xff]  ;;  %v32_v21 = vld [vmem:[%s510_s0 + $0x80] sm:$0xff]  ;;  %v31_v24 = vld [vmem:[%s510_s0 + $0x78] sm:$0xff] }
   0x6   :  { %v28_v22 = vld [vmem:[%s510_s0 + $0x60] sm:$0xff]  ;;  %238 = vmatprep.subr.bf16.mxu0 %v237_v14  ;;  %272 = vmatprep.subr.bf16.mxu1 %v299_v2  ;;  %v241_v23 = vpack.c.bf16 %v32_v21, %v29_v20  ;;  %v30_v25 = vld [vmem:[%s510_s0 + $0x70] sm:$0xff]  ;;  %v33_v26 = vld [vmem:[%s510_s0 + $0x88] sm:$0xff] }
   0x7   :  { %v35_v27 = vld [vmem:[%s510_s0 + $0x98] sm:$0xff]  ;;  %v38_v28 = vld [vmem:[%s510_s0 + $0xb0] sm:$0xff]  ;;  %v243_v29 = vpack.c.bf16 %v31_v24, %v28_v22  ;;  %v276_v30 = vpack.c.bf16 %v33_v26, %v30_v25  ;;  %v37_v33 = vld [vmem:[%s510_s0 + $0xa8] sm:$0xff] }
   0x8   :  { %v34_v31 = vld [vmem:[%s510_s0 + $0x90] sm:$0xff]  ;;  %v245_v32 = vpack.c.bf16 %v38_v28, %v35_v27  ;;  %v36_v34 = vld [vmem:[%s510_s0 + $0xa0] sm:$0xff]  ;;  %v39_v35 = vld [vmem:[%s510_s0 + $0xb8] sm:$0xff] }
   0x9   :  { %240 = vmatpush1.bf16.msra.mxu0 %v239_v18  ;;  %274 = vmatpush1.bf16.msra.mxu1 %v273_v19  ;;  %v41_v36 = vld [vmem:[%s510_s0 + $0xc8] sm:$0xff]  ;;  %v44_v37 = vld [vmem:[%s510_s0 + $0xe0] sm:$0xff]  ;;  %v247_v38 = vpack.c.bf16 %v37_v33, %v34_v31  ;;  %v279_v39 = vpack.c.bf16 %v39_v35, %v36_v34  ;;  %v43_v42 = vld [vmem:[%s510_s0 + $0xd8] sm:$0xff] }
   0xa   :  { %242 = vmatprep.subr.bf16.mxu0 %v241_v23  ;;  %275 = vmatprep.subr.bf16.mxu1 %v299_v2  ;;  %v40_v40 = vld [vmem:[%s510_s0 + $0xc0] sm:$0xff]  ;;  %v249_v41 = vpack.c.bf16 %v44_v37, %v41_v36  ;;  %v42_v43 = vld [vmem:[%s510_s0 + $0xd0] sm:$0xff]  ;;  %v45_v44 = vld [vmem:[%s510_s0 + $0xe8] sm:$0xff] }
   0xb   :  { %v47_v45 = vld [vmem:[%s510_s0 + $0xf8] sm:$0xff]  ;;  %v50_v46 = vld [vmem:[%s510_s0 + $0x110] sm:$0xff]  ;;  %v251_v47 = vpack.c.bf16 %v43_v42, %v40_v40  ;;  %v282_v48 = vpack.c.bf16 %v45_v44, %v42_v43  ;;  %v49_v51 = vld [vmem:[%s510_s0 + $0x108] sm:$0xff] }
   0xc   :  { %v46_v49 = vld [vmem:[%s510_s0 + $0xf0] sm:$0xff]  ;;  %v253_v50 = vpack.c.bf16 %v50_v46, %v47_v45  ;;  %v48_v52 = vld [vmem:[%s510_s0 + $0x100] sm:$0xff]  ;;  %v51_v53 = vld [vmem:[%s510_s0 + $0x118] sm:$0xff] }
   0xd   :  { %244 = vmatpush1.bf16.msra.mxu0 %v243_v29  ;;  %277 = vmatpush1.bf16.msra.mxu1 %v276_v30  ;;  %v53_v54 = vld [vmem:[%s510_s0 + $0x128] sm:$0xff]  ;;  %v56_v55 = vld [vmem:[%s510_s0 + $0x140] sm:$0xff]  ;;  %v255_v58 = vpack.c.bf16 %v49_v51, %v46_v49  ;;  %v285_v59 = vpack.c.bf16 %v51_v53, %v48_v52  ;;  %v55_v62 = vld [vmem:[%s510_s0 + $0x138] sm:$0xff] }
   0xe   :  { %246 = vmatprep.subr.bf16.mxu0 %v245_v32  ;;  %278 = vmatprep.subr.bf16.mxu1 %v299_v2  ;;  %v15_v56 = vld [vmem:[%s511_s1 + $0x8] sm:$0xff]  ;;  %v70_v57 = vld [vmem:[%s512_s2] sm:$0xff]  ;;  %v257_v61 = vpack.c.bf16 %v56_v55, %v53_v54  ;;  %v54_v63 = vld [vmem:[%s510_s0 + $0x130] sm:$0xff] }
   0xf   :  { %231 = vmatprep.mubr.msk.f32.mxu0 %vm76_vm0, %v15_v56  ;;  %232 = vmatprep.mubr.msk.f32.mxu1 %vm76_vm0, %v15_v56  ;;  %v52_v60 = vld [vmem:[%s510_s0 + $0x120] sm:$0xff]  ;;  %v57_v0 = vld [vmem:[%s510_s0 + $0x148] sm:$0xff]  ;;  %v59_v1 = vld [vmem:[%s510_s0 + $0x158] sm:$0xff] }
  0x10   :  { %v62_v3 = vld [vmem:[%s510_s0 + $0x170] sm:$0xff]  ;;  %73 = vperm.xlu0 %298, %v70_v57   ;;  %v259_v4 = vpack.c.bf16 %v55_v62, %v52_v60  ;;  %v288_v5 = vpack.c.bf16 %v57_v0, %v54_v63  ;;  %v61_v8 = vld [vmem:[%s510_s0 + $0x168] sm:$0xff]  ;;  %v60_v9 = vld [vmem:[%s510_s0 + $0x160] sm:$0xff] }
  0x11   :  { %248 = vmatpush1.bf16.msra.mxu0 %v247_v38  ;;  %280 = vmatpush1.bf16.msra.mxu1 %v279_v39  ;;  %v58_v6 = vld [vmem:[%s510_s0 + $0x150] sm:$0xff]  ;;  %v261_v7 = vpack.c.bf16 %v62_v3, %v59_v1  ;;  %v63_v10 = vld [vmem:[%s510_s0 + $0x178] sm:$0xff]  ;;  %v65_v11 = vld [vmem:[%s510_s0 + $0x188] sm:$0xff] }
  0x12   :  { %250 = vmatprep.subr.bf16.mxu0 %v249_v41  ;;  %281 = vmatprep.subr.bf16.mxu1 %v299_v2  ;;  %v68_v12 = vld [vmem:[%s510_s0 + $0x1a0] sm:$0xff]  ;;  %v263_v13 = vpack.c.bf16 %v61_v8, %v58_v6  ;;  %v291_v14 = vpack.c.bf16 %v63_v10, %v60_v9  ;;  %v67_v17 = vld [vmem:[%s510_s0 + $0x198] sm:$0xff]  ;;  %v66_v18 = vld [vmem:[%s510_s0 + $0x190] sm:$0xff] }
  0x13   :  { %v64_v15 = vld [vmem:[%s510_s0 + $0x180] sm:$0xff]  ;;  %v265_v16 = vpack.c.bf16 %v68_v12, %v65_v11  ;;  %v69_v19 = vld [vmem:[%s510_s0 + $0x1a8] sm:$0xff] }
  0x14   :  { %v267_v20 = vpack.c.bf16 %v67_v17, %v64_v15  ;;  %v294_v21 = vpack.c.bf16 %v69_v19, %v66_v18  ;;  %v14_v22 = vld [vmem:[%s511_s1] sm:$0xff] }
  0x15   :  { %252 = vmatpush1.bf16.msra.mxu0 %v251_v47  ;;  %283 = vmatpush1.bf16.msra.mxu1 %v282_v48 }
  0x16   :  { %254 = vmatprep.subr.bf16.mxu0 %v253_v50  ;;  %284 = vmatprep.subr.bf16.mxu1 %v299_v2 }
  0x19   :  { %256 = vmatpush1.bf16.msra.mxu0 %v255_v58  ;;  %286 = vmatpush1.bf16.msra.mxu1 %v285_v59 }
  0x1a   :  { %258 = vmatprep.subr.bf16.mxu0 %v257_v61  ;;  %287 = vmatprep.subr.bf16.mxu1 %v299_v2 }
  0x1d   :  { %260 = vmatpush1.bf16.msra.mxu0 %v259_v4  ;;  %289 = vmatpush1.bf16.msra.mxu1 %v288_v5 }
  0x1e   :  { %262 = vmatprep.subr.bf16.mxu0 %v261_v7  ;;  %290 = vmatprep.subr.bf16.mxu1 %v299_v2 }
  0x21   :  { %264 = vmatpush1.bf16.msra.mxu0 %v263_v13  ;;  %292 = vmatpush1.bf16.msra.mxu1 %v291_v14 }
  0x22   :  { %266 = vmatprep.subr.bf16.mxu0 %v265_v16  ;;  %293 = vmatprep.subr.bf16.mxu1 %v299_v2 }
  0x25   :  { %268 = vmatpush1.bf16.msra.mxu0 %v267_v20  ;;  %295 = vmatpush1.bf16.msra.mxu1 %v294_v21 }
  0x28   :  { %145 = vmatmul.mubr.f32.vlgmr.msra.gmra.mrb[0].mxu0 %v14_v22  ;;  %216 = vmatmul.mubr.f32.vlgmr.msra.gmra.mrb[0].mxu1 %v14_v22 }
  0x8f   :  { %v74_v23 = vpop.permute.xlu0 %73 }
  0xfb   :  { %v146_v24 = vpop.f32.mrb[0].mxu0  ;;  %v217_v25 = vpop.f32.mrb[0].mxu1 }
  0xfc   :  { %v147_v26 = vadd.f32 %v146_v24, %v74_v23  ;;  %v218_v27 = vadd.f32 %v217_v25, %v74_v23  ;;  %v148_v28 = vpop.f32.mrb[1].mxu0  ;;  %v219_v29 = vpop.f32.mrb[1].mxu1 }
  0xfd   :  { %v149_v30 = vadd.f32 %v148_v28, %v74_v23 }
  0xfe   :  { %v221_v31 = vmax.f32 %v147_v26, 0.0  ;;  %v223_v32 = vmax.f32 %v218_v27, 0.0 }
  0xff   :  { %v222_v33 = vmax.f32 %v149_v30, 0.0 }
 0x100   :  { %224 = vst [vmem:[%s513_s3] sm:$0xff] %v221_v31  ;;  %226 = vst [vmem:[%s513_s3 + $0x10] sm:$0xff] %v223_v32 }
 0x101   :  { %225 = vst [vmem:[%s513_s3 + $0x8] sm:$0xff] %v222_v33 }

// kernel: generator_forward.8
= control target key start
LH: loop header
LB: loop body
LE: loop exit
PB: predicated region body
PF: predicated region fallthrough
CT: control target
= control target key end

     0   :  { %v724_v3 = vmov 0.0   ;;  %v725_v8 = vmov 0   ;;  %vm120_vm0 = vcmask 588800   ;;  %vm727_vm1 = vmmov 0   ;;  %s1090_s0 = inlined_call_operand.vmem [shape: f32[72,1408], index: 0, kind: input, shape index: {}]   ;;  %s1091_s1 = inlined_call_operand.vmem [shape: f32[4,72], index: 1, kind: input, shape index: {}]   ;;  %s1092_s2 = inlined_call_operand.vmem [shape: f32[4,1], index: 2, kind: input, shape index: {}]   ;;  %s1093_s3 = inlined_call_operand.vmem [shape: f32[4,1408], index: 3, kind: output, shape index: {}]  }
   0x1   :  { %v16_v0 = vld [vmem:[%s1090_s0 + $0x8] sm:$0xff]  ;;  %v27_v1 = vld [vmem:[%s1090_s0 + $0x60] sm:$0xff]  ;;  %188 = vmatprep.mubr.f32.mxu0 %v724_v3  ;;  %259 = vmatprep.mubr.f32.mxu1 %v724_v3  ;;  %v26_v5 = vld [vmem:[%s1090_s0 + $0x58] sm:$0xff] }
   0x2   :  { %v15_v2 = vld [vmem:[%s1090_s0] sm:$0xff]  ;;  %v627_v4 = vpack.c.bf16 %v27_v1, %v16_v0  ;;  %v18_v6 = vld [vmem:[%s1090_s0 + $0x18] sm:$0xff]  ;;  %v29_v7 = vld [vmem:[%s1090_s0 + $0x70] sm:$0xff]  ;;  %723 = vset.pattern.permute.xlu0 %v725_v8 }
   0x3   :  { %v629_v9 = vpack.c.bf16 %v26_v5, %v15_v2  ;;  %v643_v10 = vpack.c.bf16 %v29_v7, %v18_v6  ;;  %v17_v11 = vld [vmem:[%s1090_s0 + $0x10] sm:$0xff]  ;;  %v28_v12 = vld [vmem:[%s1090_s0 + $0x68] sm:$0xff]  ;;  %v38_v13 = vld [vmem:[%s1090_s0 + $0xb8] sm:$0xff] }
   0x4   :  { %628 = vmatprep.subr.bf16.mxu0 %v627_v4  ;;  %v645_v14 = vpack.c.bf16 %v28_v12, %v17_v11  ;;  %v49_v15 = vld [vmem:[%s1090_s0 + $0x110] sm:$0xff]  ;;  %v48_v17 = vld [vmem:[%s1090_s0 + $0x108] sm:$0xff]  ;;  %v51_v21 = vld [vmem:[%s1090_s0 + $0x120] sm:$0xff] }
   0x5   :  { %v37_v16 = vld [vmem:[%s1090_s0 + $0xb0] sm:$0xff]  ;;  %630 = vmatpush1.bf16.msra.mxu0 %v629_v9  ;;  %644 = vmatprep.subr.bf16.mxu1 %v643_v10  ;;  %v631_v18 = vpack.c.bf16 %v49_v15, %v38_v13  ;;  %v40_v20 = vld [vmem:[%s1090_s0 + $0xc8] sm:$0xff]  ;;  %v39_v22 = vld [vmem:[%s1090_s0 + $0xc0] sm:$0xff] }
   0x6   :  { %v633_v19 = vpack.c.bf16 %v48_v17, %v37_v16  ;;  %646 = vmatpush1.bf16.msra.mxu1 %v645_v14  ;;  %v647_v23 = vpack.c.bf16 %v51_v21, %v40_v20  ;;  %v50_v24 = vld [vmem:[%s1090_s0 + $0x118] sm:$0xff]  ;;  %v60_v25 = vld [vmem:[%s1090_s0 + $0x168] sm:$0xff]  ;;  %v71_v26 = vld [vmem:[%s1090_s0 + $0x1c0] sm:$0xff] }
   0x7   :  { %632 = vmatprep.subr.bf16.mxu0 %v631_v18  ;;  %v649_v27 = vpack.c.bf16 %v50_v24, %v39_v22  ;;  %v635_v28 = vpack.c.bf16 %v71_v26, %v60_v25  ;;  %v59_v29 = vld [vmem:[%s1090_s0 + $0x160] sm:$0xff]  ;;  %v70_v30 = vld [vmem:[%s1090_s0 + $0x1b8] sm:$0xff]  ;;  %v73_v32 = vld [vmem:[%s1090_s0 + $0x1d0] sm:$0xff] }
   0x8   :  { %v62_v31 = vld [vmem:[%s1090_s0 + $0x178] sm:$0xff]  ;;  %648 = vmatprep.subr.bf16.mxu1 %v647_v23  ;;  %v61_v33 = vld [vmem:[%s1090_s0 + $0x170] sm:$0xff]  ;;  %v72_v34 = vld [vmem:[%s1090_s0 + $0x1c8] sm:$0xff]  ;;  %v637_v35 = vpack.c.bf16 %v70_v30, %v59_v29 }
   0x9   :  { %634 = vmatpush1.bf16.msra.mxu0 %v633_v19  ;;  %v651_v36 = vpack.c.bf16 %v73_v32, %v62_v31  ;;  %v82_v37 = vld [vmem:[%s1090_s0 + $0x218] sm:$0xff]  ;;  %v93_v38 = vld [vmem:[%s1090_s0 + $0x270] sm:$0xff]  ;;  %v653_v40 = vpack.c.bf16 %v72_v34, %v61_v33  ;;  %v92_v42 = vld [vmem:[%s1090_s0 + $0x268] sm:$0xff] }
   0xa   :  { %v81_v39 = vld [vmem:[%s1090_s0 + $0x210] sm:$0xff]  ;;  %650 = vmatpush1.bf16.msra.mxu1 %v649_v27  ;;  %636 = vmatprep.subr.bf16.mxu0 %v635_v28  ;;  %v639_v41 = vpack.c.bf16 %v93_v38, %v82_v37  ;;  %v84_v43 = vld [vmem:[%s1090_s0 + $0x228] sm:$0xff]  ;;  %v95_v44 = vld [vmem:[%s1090_s0 + $0x280] sm:$0xff] }
   0xb   :  { %652 = vmatprep.subr.bf16.mxu1 %v651_v36  ;;  %v655_v45 = vpack.c.bf16 %v95_v44, %v84_v43  ;;  %v83_v46 = vld [vmem:[%s1090_s0 + $0x220] sm:$0xff]  ;;  %v94_v47 = vld [vmem:[%s1090_s0 + $0x278] sm:$0xff]  ;;  %v641_v48 = vpack.c.bf16 %v92_v42, %v81_v39  ;;  %v104_v50 = vld [vmem:[%s1090_s0 + $0x2c8] sm:$0xff] }
   0xc   :  { %v657_v49 = vpack.c.bf16 %v94_v47, %v83_v46  ;;  %v106_v51 = vld [vmem:[%s1090_s0 + $0x2d8] sm:$0xff]  ;;  %v20_v52 = vld [vmem:[%s1090_s0 + $0x28] sm:$0xff]  ;;  %v103_v53 = vld [vmem:[%s1090_s0 + $0x2c0] sm:$0xff] }
   0xd   :  { %638 = vmatpush1.bf16.msra.mxu0 %v637_v35  ;;  %v31_v54 = vld [vmem:[%s1090_s0 + $0x80] sm:$0xff]  ;;  %v22_v55 = vld [vmem:[%s1090_s0 + $0x38] sm:$0xff]  ;;  %v33_v56 = vld [vmem:[%s1090_s0 + $0x90] sm:$0xff] }
   0xe   :  { %654 = vmatpush1.bf16.msra.mxu1 %v653_v40  ;;  %640 = vmatprep.subr.bf16.mxu0 %v639_v41  ;;  %v870_v57 = vld [vmem:[%s1091_s1] sm:$0xf]  ;;  %v30_v59 = vld [vmem:[%s1090_s0 + $0x78] sm:$0xff]  ;;  %v21_v60 = vld [vmem:[%s1090_s0 + $0x30] sm:$0xff]  ;;  %v659_v1 = vpack.c.bf16 %v31_v54, %v20_v52  ;;  %v675_v2 = vpack.c.bf16 %v33_v56, %v22_v55 }
   0xf   :  { %656 = vmatprep.subr.bf16.mxu1 %v655_v45  ;;  %v19_v58 = vld [vmem:[%s1090_s0 + $0x20] sm:$0xff]  ;;  %v32_v61 = vld [vmem:[%s1090_s0 + $0x88] sm:$0xff]  ;;  %v42_v62 = vld [vmem:[%s1090_s0 + $0xd8] sm:$0xff] }
  0x10   :  { %v53_v63 = vld [vmem:[%s1090_s0 + $0x130] sm:$0xff]  ;;  %v44_v4 = vld [vmem:[%s1090_s0 + $0xe8] sm:$0xff]  ;;  %v55_v5 = vld [vmem:[%s1090_s0 + $0x140] sm:$0xff]  ;;  %v661_v6 = vpack.c.bf16 %v30_v59, %v19_v58  ;;  %v677_v7 = vpack.c.bf16 %v32_v61, %v21_v60 }
  0x11   :  { %642 = vmatpush1.bf16.msra.mxu0 %v641_v48  ;;  %v105_v0 = vld [vmem:[%s1090_s0 + $0x2d0] sm:$0xff]  ;;  %v663_v8 = vpack.c.bf16 %v53_v63, %v42_v62  ;;  %v52_v10 = vld [vmem:[%s1090_s0 + $0x128] sm:$0xff]  ;;  %v43_v11 = vld [vmem:[%s1090_s0 + $0xe0] sm:$0xff]  ;;  %v679_v12 = vpack.c.bf16 %v55_v5, %v44_v4 }
  0x12   :  { %658 = vmatpush1.bf16.msra.mxu1 %v657_v49  ;;  %140 = vmatprep.subr.mxu0 %v104_v50  ;;  %v41_v9 = vld [vmem:[%s1090_s0 + $0xd0] sm:$0xff]  ;;  %v54_v13 = vld [vmem:[%s1090_s0 + $0x138] sm:$0xff]  ;;  %v64_v14 = vld [vmem:[%s1090_s0 + $0x188] sm:$0xff] }
  0x13   :  { %211 = vmatprep.subr.mxu1 %v106_v51  ;;  %v75_v15 = vld [vmem:[%s1090_s0 + $0x1e0] sm:$0xff]  ;;  %v66_v16 = vld [vmem:[%s1090_s0 + $0x198] sm:$0xff]  ;;  %v77_v17 = vld [vmem:[%s1090_s0 + $0x1f0] sm:$0xff]  ;;  %v665_v18 = vpack.c.bf16 %v52_v10, %v41_v9  ;;  %v681_v19 = vpack.c.bf16 %v54_v13, %v43_v11 }
  0x14   :  { %v667_v20 = vpack.c.bf16 %v75_v15, %v64_v14  ;;  %v63_v21 = vld [vmem:[%s1090_s0 + $0x180] sm:$0xff]  ;;  %v74_v22 = vld [vmem:[%s1090_s0 + $0x1d8] sm:$0xff]  ;;  %v65_v23 = vld [vmem:[%s1090_s0 + $0x190] sm:$0xff]  ;;  %v683_v24 = vpack.c.bf16 %v77_v17, %v66_v16 }
  0x15   :  { %141 = vmatpush1.msra.mxu0 %v103_v53  ;;  %v76_v25 = vld [vmem:[%s1090_s0 + $0x1e8] sm:$0xff]  ;;  %v86_v26 = vld [vmem:[%s1090_s0 + $0x238] sm:$0xff]  ;;  %v97_v27 = vld [vmem:[%s1090_s0 + $0x290] sm:$0xff]  ;;  %v669_v30 = vpack.c.bf16 %v74_v22, %v63_v21 }
  0x16   :  { %590 = vmatmul.mubr.msk.f32.vlgmr.msra.gmra.mrb[0].mxu0 %vm120_vm0, %v870_v57  ;;  %212 = vmatpush1.msra.mxu1 %v105_v0  ;;  %v88_v28 = vld [vmem:[%s1090_s0 + $0x248] sm:$0xff]  ;;  %v99_v29 = vld [vmem:[%s1090_s0 + $0x2a0] sm:$0xff]  ;;  %v685_v31 = vpack.c.bf16 %v76_v25, %v65_v23  ;;  %v671_v32 = vpack.c.bf16 %v97_v27, %v86_v26  ;;  %v85_v33 = vld [vmem:[%s1090_s0 + $0x230] sm:$0xff]  ;;  %v726_v0 = vmov 0.0|0.0  }
  0x17   :  { %660 = vmatprep.subr.bf16.mxu0 %v659_v1  ;;  %676 = vmatprep.subr.bf16.mxu1 %v675_v2  ;;  %v96_v34 = vld [vmem:[%s1090_s0 + $0x288] sm:$0xff]  ;;  %v687_v35 = vpack.c.bf16 %v99_v29, %v88_v28  ;;  %v87_v36 = vld [vmem:[%s1090_s0 + $0x240] sm:$0xff]  ;;  %v98_v37 = vld [vmem:[%s1090_s0 + $0x298] sm:$0xff] }
  0x18   :  { %662 = vmatpush1.bf16.msra.mxu0 %v661_v6  ;;  %591 = vmatmul.mubr.msk.f32.vlgmr.msra.gmra.mrb[0].mxu1 %vm120_vm0, %v870_v57  ;;  %v673_v38 = vpack.c.bf16 %v96_v34, %v85_v33  ;;  %v689_v39 = vpack.c.bf16 %v98_v37, %v87_v36  ;;  %v108_v40 = vld [vmem:[%s1090_s0 + $0x2e8] sm:$0xff]  ;;  %v114_v41 = vld [vmem:[%s1092_s2] sm:$0xf]  ;;  %v110_v43 = vld [vmem:[%s1090_s0 + $0x2f8] sm:$0xff] }
  0x19   :  { %678 = vmatpush1.bf16.msra.mxu1 %v677_v7  ;;  %664 = vmatprep.subr.bf16.mxu0 %v663_v8  ;;  %v107_v42 = vld [vmem:[%s1090_s0 + $0x2e0] sm:$0xff]  ;;  %v24_v44 = vld [vmem:[%s1090_s0 + $0x48] sm:$0xff]  ;;  %v34_v47 = vld [vmem:[%s1090_s0 + $0x98] sm:$0xff] }
  0x1a   :  { %680 = vmatprep.subr.bf16.mxu1 %v679_v12  ;;  %330 = vmatprep.mubr.f32.mxu0 %v724_v3  ;;  %v35_v45 = vld [vmem:[%s1090_s0 + $0xa0] sm:$0xff]  ;;  %v25_v48 = vld [vmem:[%s1090_s0 + $0x50] sm:$0xff]  ;;  %v36_v49 = vld [vmem:[%s1090_s0 + $0xa8] sm:$0xff] }
  0x1b   :  { %401 = vmatprep.mubr.f32.mxu1 %v724_v3  ;;  %117 = vperm.xlu0 %723, %v114_v41   ;;  %v23_v46 = vld [vmem:[%s1090_s0 + $0x40] sm:$0xff]  ;;  %v46_v50 = vld [vmem:[%s1090_s0 + $0xf8] sm:$0xff]  ;;  %v57_v51 = vld [vmem:[%s1090_s0 + $0x150] sm:$0xff]  ;;  %v691_v53 = vpack.c.bf16 %v35_v45, %v24_v44  ;;  %v708_v55 = vpack.c.bf16 %v36_v49, %v25_v48 }
  0x1c   :  { %666 = vmatpush1.bf16.msra.mxu0 %v665_v18  ;;  %v109_v52 = vld [vmem:[%s1090_s0 + $0x2f0] sm:$0xff]  ;;  %v693_v54 = vpack.c.bf16 %v34_v47, %v23_v46  ;;  %v695_v56 = vpack.c.bf16 %v57_v51, %v46_v50  ;;  %v56_v59 = vld [vmem:[%s1090_s0 + $0x148] sm:$0xff]  ;;  %v47_v60 = vld [vmem:[%s1090_s0 + $0x100] sm:$0xff] }
  0x1d   :  { %682 = vmatpush1.bf16.msra.mxu1 %v681_v19  ;;  %668 = vmatprep.subr.bf16.mxu0 %v667_v20  ;;  %v45_v58 = vld [vmem:[%s1090_s0 + $0xf0] sm:$0xff]  ;;  %v58_v61 = vld [vmem:[%s1090_s0 + $0x158] sm:$0xff]  ;;  %v68_v62 = vld [vmem:[%s1090_s0 + $0x1a8] sm:$0xff] }
  0x1e   :  { %684 = vmatprep.subr.bf16.mxu1 %v683_v24  ;;  %v79_v63 = vld [vmem:[%s1090_s0 + $0x200] sm:$0xff]  ;;  %v697_v1 = vpack.c.bf16 %v56_v59, %v45_v58  ;;  %v711_v2 = vpack.c.bf16 %v58_v61, %v47_v60  ;;  %v78_v6 = vld [vmem:[%s1090_s0 + $0x1f8] sm:$0xff]  ;;  %v69_v7 = vld [vmem:[%s1090_s0 + $0x1b0] sm:$0xff] }
  0x1f   :  { %v699_v4 = vpack.c.bf16 %v79_v63, %v68_v62  ;;  %v67_v5 = vld [vmem:[%s1090_s0 + $0x1a0] sm:$0xff]  ;;  %v80_v8 = vld [vmem:[%s1090_s0 + $0x208] sm:$0xff]  ;;  %v90_v9 = vld [vmem:[%s1090_s0 + $0x258] sm:$0xff] }
  0x20   :  { %670 = vmatpush1.bf16.msra.mxu0 %v669_v30  ;;  %v101_v10 = vld [vmem:[%s1090_s0 + $0x2b0] sm:$0xff]  ;;  %v701_v11 = vpack.c.bf16 %v78_v6, %v67_v5  ;;  %v714_v12 = vpack.c.bf16 %v80_v8, %v69_v7  ;;  %v100_v15 = vld [vmem:[%s1090_s0 + $0x2a8] sm:$0xff]  ;;  %v91_v16 = vld [vmem:[%s1090_s0 + $0x260] sm:$0xff] }
  0x21   :  { %686 = vmatpush1.bf16.msra.mxu1 %v685_v31  ;;  %672 = vmatprep.subr.bf16.mxu0 %v671_v32  ;;  %v703_v13 = vpack.c.bf16 %v101_v10, %v90_v9  ;;  %v89_v14 = vld [vmem:[%s1090_s0 + $0x250] sm:$0xff]  ;;  %v102_v17 = vld [vmem:[%s1090_s0 + $0x2b8] sm:$0xff]  ;;  %v112_v20 = vld [vmem:[%s1090_s0 + $0x308] sm:$0xff] }
  0x22   :  { %688 = vmatprep.subr.bf16.mxu1 %v687_v35  ;;  %v705_v18 = vpack.c.bf16 %v100_v15, %v89_v14  ;;  %v717_v19 = vpack.c.bf16 %v102_v17, %v91_v16  ;;  %v111_v21 = vld [vmem:[%s1090_s0 + $0x300] sm:$0xff]  ;;  %v113_v22 = vld [vmem:[%s1090_s0 + $0x310] sm:$0xff] }
  0x24   :  { %674 = vmatpush1.bf16.msra.mxu0 %v673_v38 }
  0x25   :  { %690 = vmatpush1.bf16.msra.mxu1 %v689_v39  ;;  %282 = vmatprep.subr.mxu0 %v108_v40 }
  0x26   :  { %353 = vmatprep.subr.mxu1 %v110_v43 }
  0x28   :  { %283 = vmatpush1.msra.mxu0 %v107_v42 }
  0x29   :  { %592 = vmatmul.mubr.msk.f32.vlgmr.msra.gmra.mrb[2].mxu0 %vm120_vm0, %v870_v57  ;;  %354 = vmatpush1.msra.mxu1 %v109_v52 }
  0x2a   :  { %692 = vmatprep.subr.bf16.mxu0 %v691_v53  ;;  %707 = vmatprep.subr.bf16.mxu1 %v726_v0 }
  0x2b   :  { %694 = vmatpush1.bf16.msra.mxu0 %v693_v54  ;;  %593 = vmatmul.mubr.msk.f32.vlgmr.msra.gmra.mrb[2].mxu1 %vm120_vm0, %v870_v57 }
  0x2c   :  { %709 = vmatpush3.bf16.msra.mxu1 %v708_v55  ;;  %696 = vmatprep.subr.bf16.mxu0 %v695_v56 }
  0x2d   :  { %710 = vmatprep.subr.bf16.mxu1 %v726_v0  ;;  %472 = vmatprep.mubr.f32.mxu0 %v724_v3 }
  0x2e   :  { %624 = vmatprep.mubr.msk.f32.mxu1 %vm727_vm1, %v724_v3 }
  0x2f   :  { %698 = vmatpush1.bf16.msra.mxu0 %v697_v1 }
  0x30   :  { %712 = vmatpush3.bf16.msra.mxu1 %v711_v2  ;;  %700 = vmatprep.subr.bf16.mxu0 %v699_v4 }
  0x31   :  { %713 = vmatprep.subr.bf16.mxu1 %v726_v0 }
  0x33   :  { %702 = vmatpush1.bf16.msra.mxu0 %v701_v11 }
  0x34   :  { %715 = vmatpush3.bf16.msra.mxu1 %v714_v12  ;;  %704 = vmatprep.subr.bf16.mxu0 %v703_v13 }
  0x35   :  { %716 = vmatprep.subr.bf16.mxu1 %v726_v0 }
  0x37   :  { %706 = vmatpush1.bf16.msra.mxu0 %v705_v18 }
  0x38   :  { %718 = vmatpush3.bf16.msra.mxu1 %v717_v19  ;;  %424 = vmatprep.subr.mxu0 %v112_v20 }
  0x39   :  { %622 = vmatprep.subr.mxu1 %v724_v3 }
  0x3b   :  { %425 = vmatpush1.msra.mxu0 %v111_v21 }
  0x3c   :  { %594 = vmatmul.mubr.msk.f32.vlgmr.msra.gmra.mrb[4].mxu0 %vm120_vm0, %v870_v57  ;;  %623 = vmatpush3.msra.mxu1 %v113_v22 }
  0x3d   :  { %625 = vmatmul.mubr.msk.f32.vlgmr.msra.gmra.mrb[4].mxu1 %vm120_vm0, %v870_v57 }
  0x9a   :  { %v118_v23 = vpop.permute.xlu0 %117 }
  0xe9   :  { %v190_v24 = vpop.f32.mrb[0].mxu0 }
  0xea   :  { %v191_v25 = vadd.f32 %v190_v24, %v118_v23  ;;  %v192_v26 = vpop.f32.mrb[1].mxu0 }
  0xeb   :  { %v193_v27 = vadd.f32 %v192_v26, %v118_v23  ;;  %v261_v28 = vpop.f32.mrb[0].mxu1 }
  0xec   :  { %v549_v29 = vmax.f32 %v191_v25, 0.0  ;;  %v262_v3 = vadd.f32 %v261_v28, %v118_v23  ;;  %v263_v30 = vpop.f32.mrb[1].mxu1 }
  0xed   :  { %v550_v31 = vmax.f32 %v193_v27, 0.0  ;;  %v264_v32 = vadd.f32 %v263_v30, %v118_v23 }
  0xee   :  { %v551_v33 = vmax.f32 %v262_v3, 0.0 }
  0xef   :  { %v570_v34 = vcombine.low %v549_v29, %v550_v31  ;;  %v552_v35 = vmax.f32 %v264_v32, 0.0 }
  0xf1   :  { %580 = vst [vmem:[%s1093_s3] sm:$0xff] %v570_v34  ;;  %v571_v36 = vcombine.low %v551_v33, %v552_v35 }
  0xf3   :  { %581 = vst [vmem:[%s1093_s3 + $0x8] sm:$0xff] %v571_v36 }
  0xfc   :  { %v332_v57 = vpop.f32.mrb[2].mxu0 }
  0xfd   :  { %v333_v37 = vadd.f32 %v332_v57, %v118_v23  ;;  %v334_v38 = vpop.f32.mrb[3].mxu0 }
  0xfe   :  { %v335_v39 = vadd.f32 %v334_v38, %v118_v23  ;;  %v403_v40 = vpop.f32.mrb[2].mxu1 }
  0xff   :  { %v553_v41 = vmax.f32 %v333_v37, 0.0  ;;  %v404_v42 = vadd.f32 %v403_v40, %v118_v23  ;;  %v405_v43 = vpop.f32.mrb[3].mxu1 }
 0x100   :  { %v554_v44 = vmax.f32 %v335_v39, 0.0  ;;  %v406_v45 = vadd.f32 %v405_v43, %v118_v23 }
 0x101   :  { %v555_v46 = vmax.f32 %v404_v42, 0.0 }
 0x102   :  { %v572_v47 = vcombine.low %v553_v41, %v554_v44  ;;  %v556_v48 = vmax.f32 %v406_v45, 0.0 }
 0x104   :  { %582 = vst [vmem:[%s1093_s3 + $0x10] sm:$0xff] %v572_v47  ;;  %v573_v49 = vcombine.low %v555_v46, %v556_v48 }
 0x106   :  { %583 = vst [vmem:[%s1093_s3 + $0x18] sm:$0xff] %v573_v49 }
 0x10f   :  { %v474_v50 = vpop.f32.mrb[4].mxu0 }
 0x110   :  { %v475_v51 = vadd.f32 %v474_v50, %v118_v23  ;;  %v476_v52 = vpop.f32.mrb[5].mxu0  ;;  %v545_v53 = vpop.f32.mrb[4].mxu1 }
 0x111   :  { %v477_v54 = vadd.f32 %v476_v52, %v118_v23  ;;  %v546_v55 = vadd.f32 %v545_v53, %v118_v23  ;;  %v626_v56 = vpop.f32.mrb[5].mxu1 }
 0x112   :  { %v557_v58 = vmax.f32 %v475_v51, 0.0 }
 0x113   :  { %v558_v59 = vmax.f32 %v477_v54, 0.0  ;;  %v559_v60 = vmax.f32 %v546_v55, 0.0 }
 0x115   :  { %v574_v61 = vcombine.low %v557_v58, %v558_v59  ;;  %585 = vst [vmem:[%s1093_s3 + $0x28] sm:$0xf] %v559_v60 }
 0x117   :  { %584 = vst [vmem:[%s1093_s3 + $0x20] sm:$0xff] %v574_v61 }

// kernel: generator_forward.9
= control target key start
LH: loop header
LB: loop body
LE: loop exit
PB: predicated region body
PF: predicated region fallthrough
CT: control target
= control target key end

     0   :  { %v987_v3 = vmov 0.0   ;;  %v988_v9 = vmov 0   ;;  %vm96_vm0 = vcmask 1043456   ;;  %vm92_vm1 = vcmask 293888   ;;  %s1290_s0 = inlined_call_operand.vmem [shape: f32[36,1664], index: 0, kind: input, shape index: {}]   ;;  %s1291_s2 = inlined_call_operand.<no memory space> [shape: f32[1,1], index: 2, kind: input, shape index: {}]   ;;  %s1292_s1 = inlined_call_operand.vmem [shape: f32[1,36], index: 1, kind: input, shape index: {}]   ;;  %s1293_s3 = inlined_call_operand.vmem [shape: f32[1,1664], index: 3, kind: output, shape index: {}]  }
   0x1   :  { %v18_v0 = vld [vmem:[%s1290_s0 + $0x8] sm:$0xff]  ;;  %v31_v1 = vld [vmem:[%s1290_s0 + $0x70] sm:$0xff]  ;;  %v20_v2 = vld [vmem:[%s1290_s0 + $0x18] sm:$0xff]  ;;  %200 = vmatprep.mubr.f32.mxu0 %v987_v3  ;;  %271 = vmatprep.mubr.f32.mxu1 %v987_v3  ;;  %v8_v4 = vstv %s1291_s2  ;;  %vm990_vm2 = vmmov 0  }
   0x2   :  { %v875_v5 = vpack.c.bf16 %v31_v1, %v18_v0  ;;  %v33_v6 = vld [vmem:[%s1290_s0 + $0x80] sm:$0xff]  ;;  %v30_v8 = vld [vmem:[%s1290_s0 + $0x68] sm:$0xff]  ;;  %934 = vset.pattern.permute.xlu0 %v988_v9  ;;  %9 = vst [vmem:[#allocation2] sm:$0x1] %v8_v4  ;;  %v19_v12 = vld [vmem:[%s1290_s0 + $0x10] sm:$0xff] }
   0x3   :  { %v17_v7 = vld [vmem:[%s1290_s0] sm:$0xff]  ;;  %v883_v10 = vpack.c.bf16 %v33_v6, %v20_v2  ;;  %v32_v13 = vld [vmem:[%s1290_s0 + $0x78] sm:$0xff]  ;;  %v46_v17 = vld [vmem:[%s1290_s0 + $0xe8] sm:$0xff] }
   0x4   :  { %v877_v11 = vpack.c.bf16 %v30_v8, %v17_v7  ;;  %v44_v14 = vld [vmem:[%s1290_s0 + $0xd8] sm:$0xff]  ;;  %876 = vmatprep.subr.bf16.mxu0 %v875_v5  ;;  %v885_v15 = vpack.c.bf16 %v32_v13, %v19_v12  ;;  %v57_v16 = vld [vmem:[%s1290_s0 + $0x140] sm:$0xff]  ;;  %v59_v18 = vld [vmem:[%s1290_s0 + $0x150] sm:$0xff] }
   0x5   :  { %884 = vmatprep.subr.bf16.mxu1 %v883_v10  ;;  %v879_v19 = vpack.c.bf16 %v57_v16, %v44_v14  ;;  %v887_v20 = vpack.c.bf16 %v59_v18, %v46_v17  ;;  %v43_v21 = vld [vmem:[%s1290_s0 + $0xd0] sm:$0xff]  ;;  %v56_v22 = vld [vmem:[%s1290_s0 + $0x138] sm:$0xff]  ;;  %v45_v23 = vld [vmem:[%s1290_s0 + $0xe0] sm:$0xff] }
   0x6   :  { %878 = vmatpush1.bf16.msra.mxu0 %v877_v11  ;;  %886 = vmatpush1.bf16.msra.mxu1 %v885_v15  ;;  %v881_v24 = vpack.c.bf16 %v56_v22, %v43_v21  ;;  %v58_v25 = vld [vmem:[%s1290_s0 + $0x148] sm:$0xff]  ;;  %v72_v28 = vld [vmem:[%s1290_s0 + $0x1b8] sm:$0xf]  ;;  %v69_v29 = vld [vmem:[%s1290_s0 + $0x1a0] sm:$0xf] }
   0x7   :  { %880 = vmatprep.subr.bf16.mxu0 %v879_v19  ;;  %888 = vmatprep.subr.bf16.mxu1 %v887_v20  ;;  %v889_v26 = vpack.c.bf16 %v58_v25, %v45_v23  ;;  %v70_v27 = vld [vmem:[%s1290_s0 + $0x1a8] sm:$0xf]  ;;  %v35_v31 = vld [vmem:[%s1290_s0 + $0x90] sm:$0xff]  ;;  %v24_v32 = vld [vmem:[%s1290_s0 + $0x38] sm:$0xff] }
   0x8   :  { %v22_v30 = vld [vmem:[%s1290_s0 + $0x28] sm:$0xff]  ;;  %v71_v33 = vld [vmem:[%s1290_s0 + $0x1b0] sm:$0xf]  ;;  %v1089_v34 = vld [vmem:[%s1292_s1] sm:$0x1] }
   0x9   :  { %v37_v35 = vld [vmem:[%s1290_s0 + $0xa0] sm:$0xff]  ;;  %v34_v37 = vld [vmem:[%s1290_s0 + $0x88] sm:$0xff]  ;;  %v23_v38 = vld [vmem:[%s1290_s0 + $0x30] sm:$0xff]  ;;  %v891_v41 = vpack.c.bf16 %v35_v31, %v22_v30  ;;  %v989_v31 = vmov 0.0|0.0  }
   0xa   :  { %882 = vmatpush1.bf16.msra.mxu0 %v881_v24  ;;  %v21_v36 = vld [vmem:[%s1290_s0 + $0x20] sm:$0xff]  ;;  %890 = vmatpush1.bf16.msra.mxu1 %v889_v26  ;;  %v36_v39 = vld [vmem:[%s1290_s0 + $0x98] sm:$0xff]  ;;  %v50_v43 = vld [vmem:[%s1290_s0 + $0x108] sm:$0xff]  ;;  %v899_v45 = vpack.c.bf16 %v37_v35, %v24_v32  ;;  %v88_v35 = vlaneseq }
   0xb   :  { %823 = vmatprep.subr.msk.mxu0 %vm96_vm0, %v70_v27  ;;  %v48_v40 = vld [vmem:[%s1290_s0 + $0xf8] sm:$0xff]  ;;  %826 = vmatprep.subr.msk.mxu1 %vm96_vm0, %v72_v28  ;;  %v61_v42 = vld [vmem:[%s1290_s0 + $0x160] sm:$0xff]  ;;  %v63_v44 = vld [vmem:[%s1290_s0 + $0x170] sm:$0xff]  ;;  %v893_v46 = vpack.c.bf16 %v34_v37, %v21_v36  ;;  %v901_v47 = vpack.c.bf16 %v36_v39, %v23_v38 }
   0xc   :  { %v895_v48 = vpack.c.bf16 %v61_v42, %v48_v40  ;;  %v47_v49 = vld [vmem:[%s1290_s0 + $0xf0] sm:$0xff]  ;;  %v60_v50 = vld [vmem:[%s1290_s0 + $0x158] sm:$0xff]  ;;  %v903_v51 = vpack.c.bf16 %v63_v44, %v50_v43  ;;  %v49_v52 = vld [vmem:[%s1290_s0 + $0x100] sm:$0xff]  ;;  %v1251_v36 = vshrl.u32 %v88_v35, 7  ;;  %vm816_vm3 = vcmp.lt.s32.totalorder %v88_v35, 640 }
   0xd   :  { %v62_v53 = vld [vmem:[%s1290_s0 + $0x168] sm:$0xff]  ;;  %v897_v54 = vpack.c.bf16 %v60_v50, %v47_v49  ;;  %v76_v57 = vld [vmem:[%s1290_s0 + $0x1d8] sm:$0xf]  ;;  %v73_v59 = vld [vmem:[%s1290_s0 + $0x1c0] sm:$0xf] }
   0xe   :  { %824 = vmatpush1.msk.msra.mxu0 %vm96_vm0, %v69_v29  ;;  %827 = vmatpush1.msk.msra.mxu1 %vm96_vm0, %v71_v33  ;;  %v905_v55 = vpack.c.bf16 %v62_v53, %v49_v52  ;;  %v74_v56 = vld [vmem:[%s1290_s0 + $0x1c8] sm:$0xf]  ;;  %v39_v60 = vld [vmem:[%s1290_s0 + $0xb0] sm:$0xff]  ;;  %v28_v61 = vld [vmem:[%s1290_s0 + $0x58] sm:$0xff]  ;;  %v90_v37 = vsub.s32 0, %v1251_v36 }
   0xf   :  { %825 = vmatmul.mubr.msk.f32.vlgmr.msra.gmra.mrb[0].mxu0 %vm92_vm1, %v1089_v34  ;;  %828 = vmatmul.mubr.msk.f32.vlgmr.msra.gmra.mrb[0].mxu1 %vm92_vm1, %v1089_v34  ;;  %v26_v58 = vld [vmem:[%s1290_s0 + $0x48] sm:$0xff]  ;;  %v41_v62 = vld [vmem:[%s1290_s0 + $0xc0] sm:$0xff]  ;;  %v27_v1 = vld [vmem:[%s1290_s0 + $0x50] sm:$0xff] }
  0x10   :  { %892 = vmatprep.subr.bf16.mxu0 %v891_v41  ;;  %900 = vmatprep.subr.bf16.mxu1 %v899_v45  ;;  %v25_v63 = vld [vmem:[%s1290_s0 + $0x40] sm:$0xff]  ;;  %v38_v0 = vld [vmem:[%s1290_s0 + $0xa8] sm:$0xff]  ;;  %v40_v2 = vld [vmem:[%s1290_s0 + $0xb8] sm:$0xff]  ;;  %v907_v7 = vpack.c.bf16 %v39_v60, %v26_v58  ;;  %v915_v10 = vpack.c.bf16 %v41_v62, %v28_v61 }
  0x11   :  { %894 = vmatpush1.bf16.msra.mxu0 %v893_v46  ;;  %902 = vmatpush1.bf16.msra.mxu1 %v901_v47  ;;  %v52_v4 = vld [vmem:[%s1290_s0 + $0x118] sm:$0xff]  ;;  %v65_v5 = vld [vmem:[%s1290_s0 + $0x180] sm:$0xff]  ;;  %v75_v6 = vld [vmem:[%s1290_s0 + $0x1d0] sm:$0xf]  ;;  %v909_v11 = vpack.c.bf16 %v38_v0, %v25_v63  ;;  %v917_v13 = vpack.c.bf16 %v40_v2, %v27_v1 }
  0x12   :  { %896 = vmatprep.subr.bf16.mxu0 %v895_v48  ;;  %904 = vmatprep.subr.bf16.mxu1 %v903_v51  ;;  %v54_v8 = vld [vmem:[%s1290_s0 + $0x128] sm:$0xff]  ;;  %v67_v9 = vld [vmem:[%s1290_s0 + $0x190] sm:$0xff]  ;;  %v82_v12 = vld [vmem:[#allocation2] sm:$0x1]  ;;  %v911_v14 = vpack.c.bf16 %v65_v5, %v52_v4 }
  0x13   :  { %342 = vmatprep.mubr.f32.mxu0 %v987_v3  ;;  %413 = vmatprep.mubr.f32.mxu1 %v987_v3  ;;  %v51_v15 = vld [vmem:[%s1290_s0 + $0x110] sm:$0xff]  ;;  %v64_v16 = vld [vmem:[%s1290_s0 + $0x178] sm:$0xff]  ;;  %v919_v17 = vpack.c.bf16 %v67_v9, %v54_v8  ;;  %v53_v18 = vld [vmem:[%s1290_s0 + $0x120] sm:$0xff] }
  0x14   :  { %85 = vperm.xlu0 %934, %v82_v12   ;;  %v66_v19 = vld [vmem:[%s1290_s0 + $0x188] sm:$0xff]  ;;  %v913_v20 = vpack.c.bf16 %v64_v16, %v51_v15  ;;  %v80_v23 = vld [vmem:[%s1290_s0 + $0x1f8] sm:$0xf]  ;;  %v29_v24 = vld [vmem:[%s1290_s0 + $0x60] sm:$0xff] }
  0x15   :  { %898 = vmatpush1.bf16.msra.mxu0 %v897_v54  ;;  %906 = vmatpush1.bf16.msra.mxu1 %v905_v55  ;;  %v921_v21 = vpack.c.bf16 %v66_v19, %v53_v18  ;;  %v78_v22 = vld [vmem:[%s1290_s0 + $0x1e8] sm:$0xf]  ;;  %v77_v26 = vld [vmem:[%s1290_s0 + $0x1e0] sm:$0xf]  ;;  %v79_v27 = vld [vmem:[%s1290_s0 + $0x1f0] sm:$0xf] }
  0x16   :  { %829 = vmatprep.subr.msk.mxu0 %vm96_vm0, %v74_v56  ;;  %832 = vmatprep.subr.msk.mxu1 %vm96_vm0, %v76_v57  ;;  %v42_v25 = vld [vmem:[%s1290_s0 + $0xc8] sm:$0xff]  ;;  %v55_v29 = vld [vmem:[%s1290_s0 + $0x130] sm:$0xff]  ;;  %v68_v30 = vld [vmem:[%s1290_s0 + $0x198] sm:$0xff] }
  0x17   :  { %v924_v28 = vpack.c.bf16 %v42_v25, %v29_v24  ;;  %v927_v32 = vpack.c.bf16 %v68_v30, %v55_v29  ;;  %v81_v33 = vld [vmem:[%s1290_s0 + $0x200] sm:$0xf] }
  0x19   :  { %830 = vmatpush1.msk.msra.mxu0 %vm96_vm0, %v73_v59  ;;  %833 = vmatpush1.msk.msra.mxu1 %vm96_vm0, %v75_v6 }
  0x1a   :  { %831 = vmatmul.mubr.msk.f32.vlgmr.msra.gmra.mrb[2].mxu0 %vm92_vm1, %v1089_v34  ;;  %834 = vmatmul.mubr.msk.f32.vlgmr.msra.gmra.mrb[2].mxu1 %vm92_vm1, %v1089_v34 }
  0x1b   :  { %908 = vmatprep.subr.bf16.mxu0 %v907_v7  ;;  %916 = vmatprep.subr.bf16.mxu1 %v915_v10  ;;  %v991_v7 = vmov 1966171168  }
  0x1c   :  { %910 = vmatpush1.bf16.msra.mxu0 %v909_v11  ;;  %918 = vmatpush1.bf16.msra.mxu1 %v917_v13  ;;  %v728_v8 = vunpack.c.l.s4 %v991_v7 }
  0x1d   :  { %912 = vmatprep.subr.bf16.mxu0 %v911_v14  ;;  %920 = vmatprep.subr.bf16.mxu1 %v919_v17 }
  0x1e   :  { %484 = vmatprep.mubr.f32.mxu0 %v987_v3  ;;  %555 = vmatprep.mubr.f32.mxu1 %v987_v3  ;;  %v729_v16 = vunpack.c.0.s8 %v728_v8 }
  0x20   :  { %914 = vmatpush1.bf16.msra.mxu0 %v913_v20  ;;  %922 = vmatpush1.bf16.msra.mxu1 %v921_v21 }
  0x21   :  { %835 = vmatprep.subr.msk.mxu0 %vm96_vm0, %v78_v22  ;;  %838 = vmatprep.subr.msk.mxu1 %vm96_vm0, %v80_v23 }
  0x24   :  { %836 = vmatpush1.msk.msra.mxu0 %vm96_vm0, %v77_v26  ;;  %839 = vmatpush1.msk.msra.mxu1 %vm96_vm0, %v79_v27  ;;  %v1269_v26 = vsub.s32 %v729_v16, %v1251_v36 }
  0x25   :  { %837 = vmatmul.mubr.msk.f32.vlgmr.msra.gmra.mrb[4].mxu0 %vm92_vm1, %v1089_v34  ;;  %840 = vmatmul.mubr.msk.f32.vlgmr.msra.gmra.mrb[4].mxu1 %vm92_vm1, %v1089_v34 }
  0x26   :  { %923 = vmatprep.subr.bf16.mxu0 %v989_v31  ;;  %872 = vmatprep.mubr.msk.f32.mxu0 %vm990_vm2, %v987_v3 }
  0x27   :  { %925 = vmatpush3.bf16.msra.mxu0 %v924_v28 }
  0x28   :  { %926 = vmatprep.subr.bf16.mxu0 %v989_v31 }
  0x2b   :  { %928 = vmatpush3.bf16.msra.mxu0 %v927_v32 }
  0x2c   :  { %870 = vmatprep.subr.mxu0 %v987_v3 }
  0x2f   :  { %871 = vmatpush3.msk.msra.mxu0 %vm96_vm0, %v81_v33 }
  0x30   :  { %873 = vmatmul.mubr.msk.f32.vlgmr.msra.gmra.mrb[6].mxu0 %vm92_vm1, %v1089_v34 }
  0x93   :  { %v86_v38 = vpop.permute.xlu0 %85 }
  0x94   :  { %v1254_v39 = vrot.slane %v86_v38, %v90_v37 }
  0xe2   :  { %v202_v40 = vpop.f32.mrb[0].mxu0  ;;  %v273_v41 = vpop.f32.mrb[0].mxu1 }
  0xe3   :  { %v203_v3 = vadd.f32 %v202_v40, %v1254_v39  ;;  %v204_v42 = vpop.f32.mrb[1].mxu0  ;;  %v274_v43 = vadd.f32 %v273_v41, %v1254_v39  ;;  %v275_v45 = vpop.f32.mrb[1].mxu1 }
  0xe4   :  { %v205_v44 = vadd.f32 %v204_v42, %v1254_v39  ;;  %v276_v46 = vadd.f32 %v275_v45, %v1254_v39 }
  0xe5   :  { %v843_v34 = vmul.f32 -1.442695, %v203_v3  ;;  %v845_v47 = vmul.f32 -1.442695, %v274_v43 }
  0xe6   :  { %v844_v48 = vmul.f32 -1.442695, %v205_v44  ;;  %v846_v49 = vmul.f32 -1.442695, %v276_v46 }
  0xe7   :  { %935 = vpow2.f32 %v843_v34 }
  0xe8   :  { %937 = vpow2.f32 %v845_v47 }
  0xe9   :  { %939 = vpow2.f32 %v844_v48 }
  0xea   :  { %941 = vpow2.f32 %v846_v49 }
  0xed   :  { %v344_v50 = vpop.f32.mrb[2].mxu0  ;;  %v415_v52 = vpop.f32.mrb[2].mxu1 }
  0xee   :  { %v345_v51 = vadd.f32 %v344_v50, %v1254_v39  ;;  %v346_v53 = vpop.f32.mrb[3].mxu0  ;;  %v416_v54 = vadd.f32 %v415_v52, %v1254_v39  ;;  %v417_v55 = vpop.f32.mrb[3].mxu1 }
  0xef   :  { %v347_v57 = vadd.f32 %v346_v53, %v1254_v39  ;;  %v418_v60 = vadd.f32 %v417_v55, %v1254_v39 }
  0xf0   :  { %v847_v56 = vmul.f32 -1.442695, %v345_v51  ;;  %v849_v59 = vmul.f32 -1.442695, %v416_v54 }
  0xf1   :  { %v936_v58 = vpop.eup %935  ;;  %v848_v4 = vmul.f32 -1.442695, %v347_v57  ;;  %v850_v6 = vmul.f32 -1.442695, %v418_v60 }
  0xf2   :  { %v938_v61 = vpop.eup %937  ;;  %v671_v62 = vadd.f32 1.0, %v936_v58  ;;  %943 = vpow2.f32 %v847_v56 }
  0xf3   :  { %v940_v63 = vpop.eup %939  ;;  %v673_v0 = vadd.f32 1.0, %v938_v61  ;;  %945 = vpow2.f32 %v849_v59 }
  0xf4   :  { %v942_v1 = vpop.eup %941  ;;  %947 = vrcp.f32 %v671_v62  ;;  %v672_v2 = vadd.f32 1.0, %v940_v63 }
  0xf5   :  { %949 = vrcp.f32 %v673_v0  ;;  %v674_v5 = vadd.f32 1.0, %v942_v1 }
  0xf6   :  { %951 = vrcp.f32 %v672_v2 }
  0xf7   :  { %953 = vrcp.f32 %v674_v5 }
  0xf8   :  { %955 = vpow2.f32 %v848_v4  ;;  %v486_v9 = vpop.f32.mrb[4].mxu0  ;;  %v557_v11 = vpop.f32.mrb[4].mxu1 }
  0xf9   :  { %957 = vpow2.f32 %v850_v6  ;;  %v487_v10 = vadd.f32 %v486_v9, %v1254_v39  ;;  %v488_v12 = vpop.f32.mrb[5].mxu0  ;;  %v558_v13 = vadd.f32 %v557_v11, %v1254_v39  ;;  %v559_v15 = vpop.f32.mrb[5].mxu1 }
  0xfa   :  { %v489_v14 = vadd.f32 %v488_v12, %v1254_v39  ;;  %v560_v18 = vadd.f32 %v559_v15, %v1254_v39 }
  0xfb   :  { %v851_v17 = vmul.f32 -1.442695, %v487_v10  ;;  %v853_v20 = vmul.f32 -1.442695, %v558_v13 }
  0xfc   :  { %v944_v19 = vpop.eup %943  ;;  %v852_v22 = vmul.f32 -1.442695, %v489_v14  ;;  %v854_v24 = vmul.f32 -1.442695, %v560_v18 }
  0xfd   :  { %v946_v21 = vpop.eup %945  ;;  %959 = vpow2.f32 %v851_v17  ;;  %v675_v27 = vadd.f32 1.0, %v944_v19 }
  0xfe   :  { %v948_v23 = vpop.eup %947  ;;  %961 = vpow2.f32 %v853_v20  ;;  %v677_v29 = vadd.f32 1.0, %v946_v21 }
  0xff   :  { %v950_v25 = vpop.eup %949  ;;  %963 = vpow2.f32 %v852_v22 }
 0x100   :  { %v952_v28 = vpop.eup %951  ;;  %965 = vpow2.f32 %v854_v24 }
 0x101   :  { %v954_v30 = vpop.eup %953  ;;  %v723_v31 = vcombine.low %v948_v23, %v952_v28  ;;  %967 = vrcp.f32 %v675_v27 }
 0x102   :  { %v956_v32 = vpop.eup %955  ;;  %v724_v33 = vcombine.low %v950_v25, %v954_v30  ;;  %969 = vrcp.f32 %v677_v29 }
 0x103   :  { %v958_v37 = vpop.eup %957  ;;  %v733_v38 = vrot.slane %v723_v31, %v1269_v26  ;;  %v676_v40 = vadd.f32 1.0, %v956_v32  ;;  %v628_v3 = vpop.f32.mrb[6].mxu0 }
 0x104   :  { %v740_v41 = vrot.slane %v724_v33, %v1269_v26  ;;  %v678_v36 = vadd.f32 1.0, %v958_v37  ;;  %v629_v42 = vadd.f32 %v628_v3, %v1254_v39  ;;  %v874_v43 = vpop.f32.mrb[7].mxu0 }
 0x105   :  { %971 = vrcp.f32 %v676_v40 }
 0x106   :  { %v755_v44 = vcombine.low %v733_v38, %v740_v41  ;;  %973 = vrcp.f32 %v678_v36  ;;  %v855_v45 = vmul.f32 -1.442695, %v629_v42 }
 0x107   :  { %v960_v34 = vpop.eup %959 }
 0x108   :  { %v962_v46 = vpop.eup %961  ;;  %v679_v47 = vadd.f32 1.0, %v960_v34  ;;  %975 = vpow2.f32 %v855_v45  ;;  %v763_v1 = vrot.slane %v755_v44, %v1269_v26 }
 0x109   :  { %v681_v48 = vadd.f32 1.0, %v962_v46  ;;  %v964_v49 = vpop.eup %963 }
 0x10a   :  { %v966_v50 = vpop.eup %965  ;;  %977 = vrcp.f32 %v679_v47  ;;  %v680_v51 = vadd.f32 1.0, %v964_v49 }
 0x10b   :  { %v968_v52 = vpop.eup %967  ;;  %979 = vrcp.f32 %v681_v48  ;;  %v682_v53 = vadd.f32 1.0, %v966_v50 }
 0x10c   :  { %v970_v54 = vpop.eup %969  ;;  %981 = vrcp.f32 %v680_v51 }
 0x10d   :  { %983 = vrcp.f32 %v682_v53 }
 0x10f   :  { %v972_v39 = vpop.eup %971 }
 0x110   :  { %v974_v55 = vpop.eup %973  ;;  %v725_v56 = vcombine.low %v968_v52, %v972_v39 }
 0x111   :  { %v726_v57 = vcombine.low %v970_v54, %v974_v55 }
 0x112   :  { %v976_v58 = vpop.eup %975  ;;  %v747_v59 = vrot.slane %v725_v56, %v1269_v26 }
 0x113   :  { %v754_v60 = vrot.slane %v726_v57, %v1269_v26  ;;  %v683_v61 = vadd.f32 1.0, %v976_v58 }
 0x114   :  { %v978_v63 = vpop.eup %977 }
 0x115   :  { %v756_v62 = vcombine.low %v747_v59, %v754_v60  ;;  %985 = vrcp.f32 %v683_v61  ;;  %v980_v0 = vpop.eup %979 }
 0x116   :  { %v982_v4 = vpop.eup %981 }
 0x117   :  { %v770_v2 = vrot.slane %v756_v62, %v1269_v26  ;;  %v984_v5 = vpop.eup %983  ;;  %v772_v7 = vcombine.low %v978_v63, %v982_v4 }
 0x118   :  { %v773_v8 = vcombine.low %v980_v0, %v984_v5 }
 0x119   :  { %v771_v6 = vcombine.low %v763_v1, %v770_v2  ;;  %v780_v9 = vrot.slane %v772_v7, %v1269_v26 }
 0x11a   :  { %v787_v10 = vrot.slane %v773_v8, %v1269_v26 }
 0x11b   :  { %813 = vst [vmem:[%s1293_s3] sm:$0xff] %v771_v6 }
 0x11c   :  { %v795_v11 = vcombine.low %v780_v9, %v787_v10 }
 0x11e   :  { %v802_v14 = vrot.slane %v795_v11, %v1269_v26 }
 0x11f   :  { %v986_v12 = vpop.eup %985 }
 0x120   :  { %v794_v13 = vrot.slane %v986_v12, %v1269_v26 }
 0x122   :  { %v809_v15 = vrot.slane %v794_v13, %v1269_v26 }
 0x124   :  { %v810_v16 = vcombine.low %v802_v14, %v809_v15 }
 0x126   :  { %818 = vst.msk [vmem:[%s1293_s3 + $0x8] sm:$0x1f] %vm816_vm3, %v810_v16 }

</bundles_post_ra>
